<compile_context>
chip_gen: v5e
topology: v5e:2x2
jax: 0.10.0
libtpu: 0.0.40
codegen_flags: <defaults>
</compile_context>

<pallas_src>
from itertools import permutations

import numpy as np
import jax
import jax.numpy as jnp
from jax.experimental import pallas as pl
from jax.experimental.pallas import tpu as pltpu


def _round_up(x: int, m: int) -> int:
    return ((x + m - 1) // m) * m


def _cdiv(a: int, b: int) -> int:
    return -(-a // b)


def _pit_kernel(C: int, T: int, Tc: int):
    """Kernel body factory.  C = channels, T = original time length, Tc = time chunk."""
    scale = 1.0 / (C * T)

    def kernel(onehot_ref, pred_ref, tgt_ref, out_ref, acc_x, acc_n):
        # onehot_ref: (C*C, P) f32 flattened permutation one-hots (constant block)
        # pred_ref / tgt_ref: (B_blk, C, Tc) input chunk tiles
        # out_ref: (B_blk, 1) f32
        # acc_x:   (B_blk, C*C) f32 VMEM scratch -- cross terms sum_t p_i * t_j
        # acc_n:   (B_blk, 1)   f32 VMEM scratch -- sum_i ||p_i||^2 + sum_j ||t_j||^2
        kt = pl.program_id(1)

        @pl.when(kt == 0)
        def _init():
            acc_x[...] = jnp.zeros_like(acc_x)
            acc_n[...] = jnp.zeros_like(acc_n)

        # Time reduction on the MXU: K = Tc (multiple of 256).  Keep elementwise work
        # in the input dtype; f32 accumulation via preferred_element_type.
        ones_t = jnp.ones((Tc, 1), dtype=pred_ref.dtype)

        p_rows = [pred_ref[:, i, :] for i in range(C)]   # (B_blk, Tc) each
        t_rows = [tgt_ref[:, j, :] for j in range(C)]

        # Permutation-invariant norm part (O(C*T) work instead of redoing it per pair).
        nrm = jnp.dot(p_rows[0] * p_rows[0], ones_t, preferred_element_type=jnp.float32)
        for r in p_rows[1:] + t_rows:
            nrm = nrm + jnp.dot(r * r, ones_t, preferred_element_type=jnp.float32)
        acc_n[...] += nrm

        # Cross terms X[b, i*C + j] = sum_t p_i[b, t] * t_j[b, t] -- one multiply per
        # element (the ||p||^2 + ||t||^2 - 2 p.t identity halves the per-pair VPU work).
        cols = []
        for i in range(C):
            for j in range(C):
                cols.append(jnp.dot(p_rows[i] * t_rows[j], ones_t,
                                    preferred_element_type=jnp.float32))   # (B_blk, 1)
        acc_x[...] += jnp.concatenate(cols, axis=1)                         # (B_blk, C*C)

        @pl.when(kt == pl.num_programs(1) - 1)
        def _finalize():
            # Permutation scoring: one small matmul + lane max (metric min == cross max).
            per_perm = jnp.dot(acc_x[...], onehot_ref[...],
                               preferred_element_type=jnp.float32)          # (B_blk, P)
            best = jnp.max(per_perm, axis=-1, keepdims=True)                # (B_blk, 1)
            out_ref[...] = (acc_n[...] - 2.0 * best) * scale

    return kernel


def permutation_invariant_mse(prediction: jax.Array, target: jax.Array, *,
                              time_chunk: int = 2048,
                              target_tile_bytes: int = 2 << 20) -> jax.Array:
    """Non-greedy permutation-invariant MSE.  Inputs: (B, C, T).  Output: (B,)."""
    B, C, T = prediction.shape
    assert target.shape == (B, C, T)
    itemsize = jnp.dtype(prediction.dtype).itemsize

    # Permutations as a flattened one-hot matrix (C*C, P); column p has a one at row
    # i*C + j iff permutation p assigns prediction channel i -> target channel j.
    perms = list(permutations(range(C)))          # NOTE: P = C! (exhaustive, small C only)
    P = len(perms)
    onehot_np = np.zeros((C * C, P), dtype=np.float32)
    for pidx, p in enumerate(perms):
        for i, j in enumerate(p):
            onehot_np[i * C + j, pidx] = 1.0
    onehot = jnp.asarray(onehot_np)

    # ---- time chunking: contraction depth K = Tc, a multiple of 256 ----
    Tc = int(min(_round_up(time_chunk, 256), _round_up(T, 256)))
    n_tchunks = _cdiv(T, Tc)
    T_pad = n_tchunks * Tc
    # TODO(synk): when T % Tc != 0 the zero-pad below costs an extra HBM copy; an
    # in-kernel tail mask on the last chunk would avoid it.

    # ---- batch blocking: ~2 MiB input tiles, >=2 and even grid steps when possible ----
    C_sub = _round_up(C, 8)                       # sublane padding of C inside VMEM tiles
    per_batch_tile = C_sub * Tc * itemsize
    blk_cap = max(8, (target_tile_bytes // per_batch_tile) // 8 * 8)
    B_blk = min(_round_up(B, 8), blk_cap)
    if B > 8:
        # keep at least two batch blocks so the 'parallel' axis spans both TCs (v7x)
        B_blk = min(B_blk, _round_up(_cdiv(B, 2), 8))
    n_blocks = _cdiv(B, B_blk)
    if n_blocks > 1 and n_blocks % 2 == 1:
        n_blocks += 1                             # even step count for dual-TensorCore chips
    B_pad = n_blocks * B_blk

    if (B_pad, T_pad) != (B, T):
        pad = ((0, B_pad - B), (0, 0), (0, T_pad - T))
        prediction = jnp.pad(prediction, pad)     # zero rows/tail contribute 0 to all sums
        target = jnp.pad(target, pad)

    # ---- VMEM budget derived from the chip (v5e/v6e: 128 MiB phys, v7x: 64 MiB) ----
    try:
        vmem_phys = int(getattr(pltpu.get_tpu_info(), "vmem_capacity_bytes", 64 << 20))
    except Exception:
        vmem_phys = 64 << 20                      # v7x-safe fallback
    tile_in = B_blk * C_sub * Tc * itemsize
    row_tmp = 2 * C * B_blk * Tc * max(itemsize, 4)       # hoisted channel-row copies
    needed = (4 * tile_in                          # 2 inputs x 2 pipeline buffers
              + row_tmp
              + 2 * (C * C * P * 4)                # one-hot operand
              + 8 * (B_blk * 128 * 4)              # accumulators / output / small temps
              + (8 << 20))                         # headroom for products & spills
    vmem_limit = int(min(int(0.75 * vmem_phys), max(needed, 16 << 20)))

    out = pl.pallas_call(
        _pit_kernel(C, T, Tc),
        out_shape=jax.ShapeDtypeStruct((B_pad, 1), jnp.float32),
        grid=(n_blocks, n_tchunks),
        in_specs=[
            # flattened permutation one-hots: constant block, fetched once
            pl.BlockSpec((C * C, P), lambda b, kt: (0, 0)),
            # per-step (batch block, time chunk) slabs of predictions / targets
            pl.BlockSpec((B_blk, C, Tc), lambda b, kt: (b, 0, kt)),
            pl.BlockSpec((B_blk, C, Tc), lambda b, kt: (b, 0, kt)),
        ],
        out_specs=pl.BlockSpec((B_blk, 1), lambda b, kt: (b, 0)),
        scratch_shapes=[
            pltpu.VMEM((B_blk, C * C), jnp.float32),   # cross-term accumulator
            pltpu.VMEM((B_blk, 1), jnp.float32),       # norm accumulator
        ],
        compiler_params=pltpu.CompilerParams(
            dimension_semantics=("parallel", "arbitrary"),
            vmem_limit_bytes=vmem_limit,
        ),
    )(onehot, prediction, target)

    # TODO(synk): greedy=True branch (sequential per-row argmin with Python list deletion)
    # is host-control-flow heavy and is not ported; only the greedy=False branch is here.
    # TODO(synk): the module's generic `metric` argument is specialized to per-element MSE.
    return out[:B, 0]


def _reference(prediction, target):
    """Pure-JAX reference mirroring the PyTorch forward (MSE metric, non-greedy)."""
    B, C, T = prediction.shape
    diff = prediction[:, :, None, :] - target[:, None, :, :]      # (B, C, C, T)
    cost = jnp.mean(diff * diff, axis=-1)                          # (B, C, C)
    rows = jnp.arange(C)
    cands = []
    for p in permutations(range(C)):
        cands.append(jnp.mean(cost[:, rows, jnp.asarray(p)], axis=-1))
    return jnp.min(jnp.stack(cands, axis=-1), axis=-1)             # (B,)


if __name__ == "__main__":
    key = jax.random.PRNGKey(0)
    k1, k2, k3, k4, k5, k6 = jax.random.split(key, 6)

    # Case 1: small shape consistent with the module's [batch, channel, time] contract.
    B, C, T = 2, 4, 128
    prediction = jax.random.normal(k1, (B, C, T), dtype=jnp.float32)
    target = jax.random.normal(k2, (B, C, T), dtype=jnp.float32)
    out = jax.block_until_ready(permutation_invariant_mse(prediction, target))
    ref = jax.block_until_ready(_reference(prediction, target))
    assert out.shape == (B,)
    np.testing.assert_allclose(np.asarray(out), np.asarray(ref), rtol=1e-5, atol=1e-5)

    # Case 2: exercises batch blocking, batch padding, and a multi-step parallel grid.
    B2 = 40
    pred2 = jax.random.normal(k3, (B2, C, T), dtype=jnp.float32)
    tgt2 = jax.random.normal(k4, (B2, C, T), dtype=jnp.float32)
    out2 = jax.block_until_ready(permutation_invariant_mse(pred2, tgt2))
    ref2 = jax.block_until_ready(_reference(pred2, tgt2))
    np.testing.assert_allclose(np.asarray(out2), np.asarray(ref2), rtol=1e-5, atol=1e-5)

    # Case 3: odd C and multi-chunk time axis (accumulator init/finalize + tail padding).
    B3, C3, T3 = 4, 3, 600
    pred3 = jax.random.normal(k5, (B3, C3, T3), dtype=jnp.float32)
    tgt3 = jax.random.normal(k6, (B3, C3, T3), dtype=jnp.float32)
    out3 = jax.block_until_ready(permutation_invariant_mse(pred3, tgt3, time_chunk=256))
    ref3 = jax.block_until_ready(_reference(pred3, tgt3))
    np.testing.assert_allclose(np.asarray(out3), np.asarray(ref3), rtol=1e-5, atol=1e-5)

    print("KERNEL_OK")
</pallas_src>

<mosaic_0001>
module attributes {stable_mosaic.version = 11 : i64} {
  func.func @kernel(%arg0: i32, %arg1: i32, %arg2: memref<16x24xf32, #tpu.memory_space<vmem>>, %arg3: memref<8x4x256xf32, #tpu.memory_space<vmem>>, %arg4: memref<8x4x256xf32, #tpu.memory_space<vmem>>, %arg5: memref<8x1xf32, #tpu.memory_space<vmem>>, %arg6: memref<8x16xf32, #tpu.memory_space<vmem>>, %arg7: memref<8x1xf32, #tpu.memory_space<vmem>>) attributes {dimension_semantics = [#tpu.dimension_semantics<parallel>, #tpu.dimension_semantics<arbitrary>], iteration_bounds = array<i64: 1, 1>, scalar_prefetch = 0 : i64, scratch_operands = 2 : i64, tpu.core_type = #tpu.core_type<tc>, window_params = [{pipeline_mode = #tpu.pipeline_mode<synchronous>, transform_indices = @transform_0, window_bounds = array<i64: 16, 24>}, {transform_indices = @transform_1, window_bounds = array<i64: 8, 4, 256>}, {transform_indices = @transform_2, window_bounds = array<i64: 8, 4, 256>}, {transform_indices = @transform_3, window_bounds = array<i64: 8, 1>}]} {
    %c0_i32 = arith.constant 0 : i32
    %0 = arith.cmpi eq, %arg1, %c0_i32 : i32
    %1 = arith.extui %0 : i1 to i32
    %c0_i32_0 = arith.constant 0 : i32
    %2 = arith.cmpi ne, %1, %c0_i32_0 : i32
    scf.if %2 {
      %cst_55 = arith.constant 0.000000e+00 : f32
      %85 = vector.broadcast %cst_55 : f32 to vector<8x16xf32>
      %c0_56 = arith.constant 0 : index
      %c0_57 = arith.constant 0 : index
      %86 = vector.load %arg6[%c0_56, %c0_57] : memref<8x16xf32, #tpu.memory_space<vmem>>, vector<8x16xf32>
      tpu.vector_store %arg6[%c0_56, %c0_57], %85 {strides = array<i32>} : memref<8x16xf32, #tpu.memory_space<vmem>>, vector<8x16xf32>,
      %cst_58 = arith.constant 0.000000e+00 : f32
      %87 = vector.broadcast %cst_58 : f32 to vector<8x1xf32>
      %c0_59 = arith.constant 0 : index
      %c0_60 = arith.constant 0 : index
      %88 = vector.load %arg7[%c0_59, %c0_60] : memref<8x1xf32, #tpu.memory_space<vmem>>, vector<8x1xf32>
      tpu.vector_store %arg7[%c0_59, %c0_60], %87 {strides = array<i32>} : memref<8x1xf32, #tpu.memory_space<vmem>>, vector<8x1xf32>,
    } else {
    }
    %cst = arith.constant 1.000000e+00 : f32
    %3 = vector.broadcast %cst : f32 to vector<256x1xf32>
    %c0 = arith.constant 0 : index
    %c0_1 = arith.constant 0 : index
    %c0_2 = arith.constant 0 : index
    %4 = vector.load %arg3[%c0, %c0_1, %c0_2] : memref<8x4x256xf32, #tpu.memory_space<vmem>>, vector<8x1x256xf32>
    %5 = vector.shape_cast %4 : vector<8x1x256xf32> to vector<8x256xf32>
    %c0_3 = arith.constant 0 : index
    %c1 = arith.constant 1 : index
    %c0_4 = arith.constant 0 : index
    %6 = vector.load %arg3[%c0_3, %c1, %c0_4] : memref<8x4x256xf32, #tpu.memory_space<vmem>>, vector<8x1x256xf32>
    %7 = vector.shape_cast %6 : vector<8x1x256xf32> to vector<8x256xf32>
    %c0_5 = arith.constant 0 : index
    %c2 = arith.constant 2 : index
    %c0_6 = arith.constant 0 : index
    %8 = vector.load %arg3[%c0_5, %c2, %c0_6] : memref<8x4x256xf32, #tpu.memory_space<vmem>>, vector<8x1x256xf32>
    %9 = vector.shape_cast %8 : vector<8x1x256xf32> to vector<8x256xf32>
    %c0_7 = arith.constant 0 : index
    %c3 = arith.constant 3 : index
    %c0_8 = arith.constant 0 : index
    %10 = vector.load %arg3[%c0_7, %c3, %c0_8] : memref<8x4x256xf32, #tpu.memory_space<vmem>>, vector<8x1x256xf32>
    %11 = vector.shape_cast %10 : vector<8x1x256xf32> to vector<8x256xf32>
    %c0_9 = arith.constant 0 : index
    %c0_10 = arith.constant 0 : index
    %c0_11 = arith.constant 0 : index
    %12 = vector.load %arg4[%c0_9, %c0_10, %c0_11] : memref<8x4x256xf32, #tpu.memory_space<vmem>>, vector<8x1x256xf32>
    %13 = vector.shape_cast %12 : vector<8x1x256xf32> to vector<8x256xf32>
    %c0_12 = arith.constant 0 : index
    %c1_13 = arith.constant 1 : index
    %c0_14 = arith.constant 0 : index
    %14 = vector.load %arg4[%c0_12, %c1_13, %c0_14] : memref<8x4x256xf32, #tpu.memory_space<vmem>>, vector<8x1x256xf32>
    %15 = vector.shape_cast %14 : vector<8x1x256xf32> to vector<8x256xf32>
    %c0_15 = arith.constant 0 : index
    %c2_16 = arith.constant 2 : index
    %c0_17 = arith.constant 0 : index
    %16 = vector.load %arg4[%c0_15, %c2_16, %c0_17] : memref<8x4x256xf32, #tpu.memory_space<vmem>>, vector<8x1x256xf32>
    %17 = vector.shape_cast %16 : vector<8x1x256xf32> to vector<8x256xf32>
    %c0_18 = arith.constant 0 : index
    %c3_19 = arith.constant 3 : index
    %c0_20 = arith.constant 0 : index
    %18 = vector.load %arg4[%c0_18, %c3_19, %c0_20] : memref<8x4x256xf32, #tpu.memory_space<vmem>>, vector<8x1x256xf32>
    %19 = vector.shape_cast %18 : vector<8x1x256xf32> to vector<8x256xf32>
    %20 = arith.mulf %5, %5 : vector<8x256xf32>
    %cst_21 = arith.constant dense<0.000000e+00> : vector<8x1xf32>
    %21 = tpu.matmul %20, %3, %cst_21 {dimension_numbers = #tpu.dot_dimension_numbers<[1], [0], [0], [1], [0, 0, 1, 1], [], []>} : vector<8x256xf32>, vector<256x1xf32>, vector<8x1xf32> -> vector<8x1xf32>
    %22 = arith.mulf %7, %7 : vector<8x256xf32>
    %cst_22 = arith.constant dense<0.000000e+00> : vector<8x1xf32>
    %23 = tpu.matmul %22, %3, %cst_22 {dimension_numbers = #tpu.dot_dimension_numbers<[1], [0], [0], [1], [0, 0, 1, 1], [], []>} : vector<8x256xf32>, vector<256x1xf32>, vector<8x1xf32> -> vector<8x1xf32>
    %24 = arith.addf %21, %23 : vector<8x1xf32>
    %25 = arith.mulf %9, %9 : vector<8x256xf32>
    %cst_23 = arith.constant dense<0.000000e+00> : vector<8x1xf32>
    %26 = tpu.matmul %25, %3, %cst_23 {dimension_numbers = #tpu.dot_dimension_numbers<[1], [0], [0], [1], [0, 0, 1, 1], [], []>} : vector<8x256xf32>, vector<256x1xf32>, vector<8x1xf32> -> vector<8x1xf32>
    %27 = arith.addf %24, %26 : vector<8x1xf32>
    %28 = arith.mulf %11, %11 : vector<8x256xf32>
    %cst_24 = arith.constant dense<0.000000e+00> : vector<8x1xf32>
    %29 = tpu.matmul %28, %3, %cst_24 {dimension_numbers = #tpu.dot_dimension_numbers<[1], [0], [0], [1], [0, 0, 1, 1], [], []>} : vector<8x256xf32>, vector<256x1xf32>, vector<8x1xf32> -> vector<8x1xf32>
    %30 = arith.addf %27, %29 : vector<8x1xf32>
    %31 = arith.mulf %13, %13 : vector<8x256xf32>
    %cst_25 = arith.constant dense<0.000000e+00> : vector<8x1xf32>
    %32 = tpu.matmul %31, %3, %cst_25 {dimension_numbers = #tpu.dot_dimension_numbers<[1], [0], [0], [1], [0, 0, 1, 1], [], []>} : vector<8x256xf32>, vector<256x1xf32>, vector<8x1xf32> -> vector<8x1xf32>
    %33 = arith.addf %30, %32 : vector<8x1xf32>
    %34 = arith.mulf %15, %15 : vector<8x256xf32>
    %cst_26 = arith.constant dense<0.000000e+00> : vector<8x1xf32>
    %35 = tpu.matmul %34, %3, %cst_26 {dimension_numbers = #tpu.dot_dimension_numbers<[1], [0], [0], [1], [0, 0, 1, 1], [], []>} : vector<8x256xf32>, vector<256x1xf32>, vector<8x1xf32> -> vector<8x1xf32>
    %36 = arith.addf %33, %35 : vector<8x1xf32>
    %37 = arith.mulf %17, %17 : vector<8x256xf32>
    %cst_27 = arith.constant dense<0.000000e+00> : vector<8x1xf32>
    %38 = tpu.matmul %37, %3, %cst_27 {dimension_numbers = #tpu.dot_dimension_numbers<[1], [0], [0], [1], [0, 0, 1, 1], [], []>} : vector<8x256xf32>, vector<256x1xf32>, vector<8x1xf32> -> vector<8x1xf32>
    %39 = arith.addf %36, %38 : vector<8x1xf32>
    %40 = arith.mulf %19, %19 : vector<8x256xf32>
    %cst_28 = arith.constant dense<0.000000e+00> : vector<8x1xf32>
    %41 = tpu.matmul %40, %3, %cst_28 {dimension_numbers = #tpu.dot_dimension_numbers<[1], [0], [0], [1], [0, 0, 1, 1], [], []>} : vector<8x256xf32>, vector<256x1xf32>, vector<8x1xf32> -> vector<8x1xf32>
    %42 = arith.addf %39, %41 : vector<8x1xf32>
    %c0_29 = arith.constant 0 : index
    %c0_30 = arith.constant 0 : index
    %43 = vector.load %arg7[%c0_29, %c0_30] : memref<8x1xf32, #tpu.memory_space<vmem>>, vector<8x1xf32>
    %44 = arith.addf %43, %42 : vector<8x1xf32>
    %c0_31 = arith.constant 0 : index
    %c0_32 = arith.constant 0 : index
    %45 = vector.load %arg7[%c0_31, %c0_32] : memref<8x1xf32, #tpu.memory_space<vmem>>, vector<8x1xf32>
    tpu.vector_store %arg7[%c0_31, %c0_32], %44 {strides = array<i32>} : memref<8x1xf32, #tpu.memory_space<vmem>>, vector<8x1xf32>,
    %46 = arith.mulf %5, %13 : vector<8x256xf32>
    %cst_33 = arith.constant dense<0.000000e+00> : vector<8x1xf32>
    %47 = tpu.matmul %46, %3, %cst_33 {dimension_numbers = #tpu.dot_dimension_numbers<[1], [0], [0], [1], [0, 0, 1, 1], [], []>} : vector<8x256xf32>, vector<256x1xf32>, vector<8x1xf32> -> vector<8x1xf32>
    %48 = arith.mulf %5, %15 : vector<8x256xf32>
    %cst_34 = arith.constant dense<0.000000e+00> : vector<8x1xf32>
    %49 = tpu.matmul %48, %3, %cst_34 {dimension_numbers = #tpu.dot_dimension_numbers<[1], [0], [0], [1], [0, 0, 1, 1], [], []>} : vector<8x256xf32>, vector<256x1xf32>, vector<8x1xf32> -> vector<8x1xf32>
    %50 = arith.mulf %5, %17 : vector<8x256xf32>
    %cst_35 = arith.constant dense<0.000000e+00> : vector<8x1xf32>
    %51 = tpu.matmul %50, %3, %cst_35 {dimension_numbers = #tpu.dot_dimension_numbers<[1], [0], [0], [1], [0, 0, 1, 1], [], []>} : vector<8x256xf32>, vector<256x1xf32>, vector<8x1xf32> -> vector<8x1xf32>
    %52 = arith.mulf %5, %19 : vector<8x256xf32>
    %cst_36 = arith.constant dense<0.000000e+00> : vector<8x1xf32>
    %53 = tpu.matmul %52, %3, %cst_36 {dimension_numbers = #tpu.dot_dimension_numbers<[1], [0], [0], [1], [0, 0, 1, 1], [], []>} : vector<8x256xf32>, vector<256x1xf32>, vector<8x1xf32> -> vector<8x1xf32>
    %54 = arith.mulf %7, %13 : vector<8x256xf32>
    %cst_37 = arith.constant dense<0.000000e+00> : vector<8x1xf32>
    %55 = tpu.matmul %54, %3, %cst_37 {dimension_numbers = #tpu.dot_dimension_numbers<[1], [0], [0], [1], [0, 0, 1, 1], [], []>} : vector<8x256xf32>, vector<256x1xf32>, vector<8x1xf32> -> vector<8x1xf32>
    %56 = arith.mulf %7, %15 : vector<8x256xf32>
    %cst_38 = arith.constant dense<0.000000e+00> : vector<8x1xf32>
    %57 = tpu.matmul %56, %3, %cst_38 {dimension_numbers = #tpu.dot_dimension_numbers<[1], [0], [0], [1], [0, 0, 1, 1], [], []>} : vector<8x256xf32>, vector<256x1xf32>, vector<8x1xf32> -> vector<8x1xf32>
    %58 = arith.mulf %7, %17 : vector<8x256xf32>
    %cst_39 = arith.constant dense<0.000000e+00> : vector<8x1xf32>
    %59 = tpu.matmul %58, %3, %cst_39 {dimension_numbers = #tpu.dot_dimension_numbers<[1], [0], [0], [1], [0, 0, 1, 1], [], []>} : vector<8x256xf32>, vector<256x1xf32>, vector<8x1xf32> -> vector<8x1xf32>
    %60 = arith.mulf %7, %19 : vector<8x256xf32>
    %cst_40 = arith.constant dense<0.000000e+00> : vector<8x1xf32>
    %61 = tpu.matmul %60, %3, %cst_40 {dimension_numbers = #tpu.dot_dimension_numbers<[1], [0], [0], [1], [0, 0, 1, 1], [], []>} : vector<8x256xf32>, vector<256x1xf32>, vector<8x1xf32> -> vector<8x1xf32>
    %62 = arith.mulf %9, %13 : vector<8x256xf32>
    %cst_41 = arith.constant dense<0.000000e+00> : vector<8x1xf32>
    %63 = tpu.matmul %62, %3, %cst_41 {dimension_numbers = #tpu.dot_dimension_numbers<[1], [0], [0], [1], [0, 0, 1, 1], [], []>} : vector<8x256xf32>, vector<256x1xf32>, vector<8x1xf32> -> vector<8x1xf32>
    %64 = arith.mulf %9, %15 : vector<8x256xf32>
    %cst_42 = arith.constant dense<0.000000e+00> : vector<8x1xf32>
    %65 = tpu.matmul %64, %3, %cst_42 {dimension_numbers = #tpu.dot_dimension_numbers<[1], [0], [0], [1], [0, 0, 1, 1], [], []>} : vector<8x256xf32>, vector<256x1xf32>, vector<8x1xf32> -> vector<8x1xf32>
    %66 = arith.mulf %9, %17 : vector<8x256xf32>
    %cst_43 = arith.constant dense<0.000000e+00> : vector<8x1xf32>
    %67 = tpu.matmul %66, %3, %cst_43 {dimension_numbers = #tpu.dot_dimension_numbers<[1], [0], [0], [1], [0, 0, 1, 1], [], []>} : vector<8x256xf32>, vector<256x1xf32>, vector<8x1xf32> -> vector<8x1xf32>
    %68 = arith.mulf %9, %19 : vector<8x256xf32>
    %cst_44 = arith.constant dense<0.000000e+00> : vector<8x1xf32>
    %69 = tpu.matmul %68, %3, %cst_44 {dimension_numbers = #tpu.dot_dimension_numbers<[1], [0], [0], [1], [0, 0, 1, 1], [], []>} : vector<8x256xf32>, vector<256x1xf32>, vector<8x1xf32> -> vector<8x1xf32>
    %70 = arith.mulf %11, %13 : vector<8x256xf32>
    %cst_45 = arith.constant dense<0.000000e+00> : vector<8x1xf32>
    %71 = tpu.matmul %70, %3, %cst_45 {dimension_numbers = #tpu.dot_dimension_numbers<[1], [0], [0], [1], [0, 0, 1, 1], [], []>} : vector<8x256xf32>, vector<256x1xf32>, vector<8x1xf32> -> vector<8x1xf32>
    %72 = arith.mulf %11, %15 : vector<8x256xf32>
    %cst_46 = arith.constant dense<0.000000e+00> : vector<8x1xf32>
    %73 = tpu.matmul %72, %3, %cst_46 {dimension_numbers = #tpu.dot_dimension_numbers<[1], [0], [0], [1], [0, 0, 1, 1], [], []>} : vector<8x256xf32>, vector<256x1xf32>, vector<8x1xf32> -> vector<8x1xf32>
    %74 = arith.mulf %11, %17 : vector<8x256xf32>
    %cst_47 = arith.constant dense<0.000000e+00> : vector<8x1xf32>
    %75 = tpu.matmul %74, %3, %cst_47 {dimension_numbers = #tpu.dot_dimension_numbers<[1], [0], [0], [1], [0, 0, 1, 1], [], []>} : vector<8x256xf32>, vector<256x1xf32>, vector<8x1xf32> -> vector<8x1xf32>
    %76 = arith.mulf %11, %19 : vector<8x256xf32>
    %cst_48 = arith.constant dense<0.000000e+00> : vector<8x1xf32>
    %77 = tpu.matmul %76, %3, %cst_48 {dimension_numbers = #tpu.dot_dimension_numbers<[1], [0], [0], [1], [0, 0, 1, 1], [], []>} : vector<8x256xf32>, vector<256x1xf32>, vector<8x1xf32> -> vector<8x1xf32>
    %c0_49 = arith.constant 0 : index
    %c0_50 = arith.constant 0 : index
    %78 = vector.load %arg6[%c0_49, %c0_50] : memref<8x16xf32, #tpu.memory_space<vmem>>, vector<8x16xf32>
    %79 = tpu.concatenate %47, %49, %51, %53, %55, %57, %59, %61, %63, %65, %67, %69, %71, %73, %75, %77 in 1 : vector<8x1xf32>, vector<8x1xf32>, vector<8x1xf32>, vector<8x1xf32>, vector<8x1xf32>, vector<8x1xf32>, vector<8x1xf32>, vector<8x1xf32>, vector<8x1xf32>, vector<8x1xf32>, vector<8x1xf32>, vector<8x1xf32>, vector<8x1xf32>, vector<8x1xf32>, vector<8x1xf32>, vector<8x1xf32> -> vector<8x16xf32>
    %80 = arith.addf %78, %79 : vector<8x16xf32>
    %c0_51 = arith.constant 0 : index
    %c0_52 = arith.constant 0 : index
    %81 = vector.load %arg6[%c0_51, %c0_52] : memref<8x16xf32, #tpu.memory_space<vmem>>, vector<8x16xf32>
    tpu.vector_store %arg6[%c0_51, %c0_52], %80 {strides = array<i32>} : memref<8x16xf32, #tpu.memory_space<vmem>>, vector<8x16xf32>,
    %c0_i32_53 = arith.constant 0 : i32
    %82 = arith.cmpi eq, %arg1, %c0_i32_53 : i32
    %83 = arith.extui %82 : i1 to i32
    %c0_i32_54 = arith.constant 0 : i32
    %84 = arith.cmpi ne, %83, %c0_i32_54 : i32
    scf.if %84 {
      %c0_55 = arith.constant 0 : index
      %c0_56 = arith.constant 0 : index
      %85 = vector.load %arg6[%c0_55, %c0_56] : memref<8x16xf32, #tpu.memory_space<vmem>>, vector<8x16xf32>
      %c0_57 = arith.constant 0 : index
      %c0_58 = arith.constant 0 : index
      %86 = vector.load %arg2[%c0_57, %c0_58] : memref<16x24xf32, #tpu.memory_space<vmem>>, vector<16x24xf32>
      %cst_59 = arith.constant dense<0.000000e+00> : vector<8x24xf32>
      %87 = tpu.matmul %85, %86, %cst_59 {dimension_numbers = #tpu.dot_dimension_numbers<[1], [0], [0], [1], [0, 0, 1, 1], [], []>} : vector<8x16xf32>, vector<16x24xf32>, vector<8x24xf32> -> vector<8x24xf32>
      %cst_60 = arith.constant dense<0xFF800000> : vector<8xf32>
      %88 = vector.multi_reduction <maximumf>, %87, %cst_60 [1] : vector<8x24xf32> to vector<8xf32>
      %89 = vector.shape_cast %88 : vector<8xf32> to vector<8x1xf32>
      %c0_61 = arith.constant 0 : index
      %c0_62 = arith.constant 0 : index
      %90 = vector.load %arg7[%c0_61, %c0_62] : memref<8x1xf32, #tpu.memory_space<vmem>>, vector<8x1xf32>
      %cst_63 = arith.constant 2.000000e+00 : f32
      %91 = vector.broadcast %cst_63 : f32 to vector<8x1xf32>
      %92 = arith.mulf %91, %89 : vector<8x1xf32>
      %93 = arith.subf %90, %92 : vector<8x1xf32>
      %cst_64 = arith.constant 0.001953125 : f32
      %94 = vector.broadcast %cst_64 : f32 to vector<8x1xf32>
      %95 = arith.mulf %93, %94 : vector<8x1xf32>
      %c0_65 = arith.constant 0 : index
      %c0_66 = arith.constant 0 : index
      %96 = vector.load %arg5[%c0_65, %c0_66] : memref<8x1xf32, #tpu.memory_space<vmem>>, vector<8x1xf32>
      tpu.vector_store %arg5[%c0_65, %c0_66], %95 {strides = array<i32>} : memref<8x1xf32, #tpu.memory_space<vmem>>, vector<8x1xf32>,
    } else {
    }
    return
  }
  func.func @transform_0(%arg0: i32, %arg1: i32) -> (i32, i32) {
    %c0_i32 = arith.constant 0 : i32
    %c0_i32_0 = arith.constant 0 : i32
    %c0_i32_1 = arith.constant 0 : i32
    return %c0_i32, %c0_i32_0 : i32, i32
  }
  func.func @transform_1(%arg0: i32, %arg1: i32) -> (i32, i32, i32) {
    %c0_i32 = arith.constant 0 : i32
    %c0_i32_0 = arith.constant 0 : i32
    return %arg0, %c0_i32, %arg1 : i32, i32, i32
  }
  func.func @transform_2(%arg0: i32, %arg1: i32) -> (i32, i32, i32) {
    %c0_i32 = arith.constant 0 : i32
    %c0_i32_0 = arith.constant 0 : i32
    return %arg0, %c0_i32, %arg1 : i32, i32, i32
  }
  func.func @transform_3(%arg0: i32, %arg1: i32) -> (i32, i32) {
    %c0_i32 = arith.constant 0 : i32
    %c0_i32_0 = arith.constant 0 : i32
    return %arg0, %c0_i32 : i32, i32
  }
}

</mosaic_0001>

<bundles_post_ra>
// kernel: tpu_custom_call.1
= control target key start
LH: loop header
LB: loop body
LE: loop exit
PB: predicated region body
PF: predicated region fallthrough
CT: control target
= control target key end

     0   :  { %8 = vsyncpa [#allocation5], 0  ;;  %s3727_s0 = inlined_call_operand.hbm [shape: f32[16,24], index: 0, kind: input, shape index: {}]   ;;  %s3728_s1 = inlined_call_operand.hbm [shape: f32[8,4,256], index: 1, kind: input, shape index: {}]   ;;  %s3729_s2 = inlined_call_operand.hbm [shape: f32[8,4,256], index: 2, kind: input, shape index: {}]   ;;  %s3730_s3 = inlined_call_operand.vmem [shape: f32[8,1], index: 3, kind: output, shape index: {}]  }
   0x1   :  { %9 = vsyncpa [#allocation7], 0  ;;  %s27_s14 = sshll.u32 %s3728_s1, 4  ;;  %s2304_s15 = smov [#allocation6]   ;;  %s28_s14 = int_to_ptr.hbm [resolvable:$true] %s27_s14 }
   0x2   :  { %s29_s16 = sshll.u32 %s2304_s15, 4  ;;  %s14_s19 = sshll.u32 %s3727_s0, 4  ;;  %s30_s16 = int_to_ptr.vmem [resolvable:$true] %s29_s16  ;;  %s15_s19 = int_to_ptr.hbm [resolvable:$true] %s14_s19 }
   0x3   :  { %s2305_s20 = smov 128   ;;  %s2306_s21 = smov 8  }
   0x4   :  { %35 = dma.hbm_to_vmem [thread:$0]  %s28_s14, 1024, %s30_s16, [#allocation7], %s2305_s20, %s2305_s20, %s2306_s21  }
   0x5   :  { %s2307_s22 = smov [#allocation4]   ;;  %s40_s26 = sshll.u32 %s3729_s2, 4  ;;  %s41_s26 = int_to_ptr.hbm [resolvable:$true] %s40_s26 }
   0x6   :  { %s16_s23 = sshll.u32 %s2307_s22, 4  ;;  %s2308_s1 = smov [#allocation8]   ;;  %s17_s23 = int_to_ptr.vmem [resolvable:$true] %s16_s23 }
   0x7   :  { %22 = dma.hbm_to_vmem [thread:$0]  %s15_s19, 256, %s17_s23, [#allocation5], %s2305_s20, %s2305_s20, %s2306_s21  }
   0x8   :  { %s42_s27 = sshll.u32 %s2308_s1, 4  ;;  %s43_s27 = int_to_ptr.vmem [resolvable:$true] %s42_s27 }
   0x9   :  { %48 = dma.hbm_to_vmem [thread:$0]  %s41_s26, 1024, %s43_s27, [#allocation7], %s2305_s20, %s2305_s20, %s2306_s21  }
   0xa   :  { %2300 = dma.done.wait [#allocation5], 256  }
   0xb   :  { %2301 = vsyncadd [#allocation5], 4294967040 }
   0xc   :  { %2302 = dma.done.wait [#allocation7], 2048  }
   0xd   :  { %2303 = vsyncadd [#allocation7], 4294965248  ;;  %v2309_v0 = vmov 1.0   ;;  %v85_v1 = vld [vmem:[#allocation6 + $0x1] ss:$4 sm:$0x3] }
   0xe   :  { %238 = vmatpush.msra.mxu0 %v2309_v0  ;;  %258 = vmatpush.msra.mxu1 %v2309_v0  ;;  %v87_v2 = vld [vmem:[#allocation6 + $0x9] ss:$4 sm:$0x3]  ;;  %v89_v3 = vld [vmem:[#allocation6 + $0x11] ss:$4 sm:$0x3]  ;;  %v203_v5 = vmul.f32 %v85_v1, %v85_v1 }
   0xf   :  { %305 = vmatpush.msra.mxu2 %v2309_v0  ;;  %325 = vmatpush.msra.mxu3 %v2309_v0  ;;  %v91_v4 = vld [vmem:[#allocation6 + $0x19] ss:$4 sm:$0x3]  ;;  %v204_v6 = vmul.f32 %v87_v2, %v87_v2  ;;  %v93_v7 = vld [vmem:[#allocation6 + $0x21] ss:$4 sm:$0x3]  ;;  %v205_v9 = vmul.f32 %v89_v3, %v89_v3 }
  0x10   :  { %239 = vmatpush.msra.mxu0 %v2309_v0  ;;  %259 = vmatpush.msra.mxu1 %v2309_v0  ;;  %v95_v8 = vld [vmem:[#allocation6 + $0x29] ss:$4 sm:$0x3]  ;;  %v97_v10 = vld [vmem:[#allocation6 + $0x31] ss:$4 sm:$0x3]  ;;  %v206_v11 = vmul.f32 %v91_v4, %v91_v4  ;;  %v207_v13 = vmul.f32 %v93_v7, %v93_v7 }
  0x11   :  { %306 = vmatpush.msra.mxu2 %v2309_v0  ;;  %326 = vmatpush.msra.mxu3 %v2309_v0  ;;  %v99_v12 = vld [vmem:[#allocation6 + $0x39] ss:$4 sm:$0x3]  ;;  %219 = vst [vmem:[#allocation1] ss:$9 sm:$0xff] %v203_v5  ;;  %v208_v14 = vmul.f32 %v95_v8, %v95_v8  ;;  %v209_v15 = vmul.f32 %v97_v10, %v97_v10  ;;  %vm67_vm0 = vcmask 7168  }
  0x12   :  { %240 = vmatpush.msra.mxu0 %v2309_v0  ;;  %260 = vmatpush.msra.mxu1 %v2309_v0  ;;  %221 = vst [vmem:[#allocation1 + $0x1] ss:$9 sm:$0xff] %v204_v6  ;;  %v210_v16 = vmul.f32 %v99_v12, %v99_v12  ;;  %v2403_v17 = vld [vmem:[#allocation6] ss:$4 sm:$0x3]  ;;  %s2311_s0 = smov 1  }
  0x13   :  { %307 = vmatpush.msra.mxu2 %v2309_v0  ;;  %327 = vmatpush.msra.mxu3 %v2309_v0  ;;  %223 = vst [vmem:[#allocation1 + $0x2] ss:$9 sm:$0xff] %v205_v9  ;;  %v2407_v18 = vld [vmem:[#allocation6 + $0x8] ss:$4 sm:$0x3]  ;;  %v195_v21 = vmul.f32 %v2403_v17, %v2403_v17  ;;  %s2312_s2 = smov 2  }
  0x14   :  { %241 = vmatpush.msra.mxu0 %v2309_v0  ;;  %261 = vmatpush.msra.mxu1 %v2309_v0  ;;  %225 = vst [vmem:[#allocation1 + $0x3] ss:$9 sm:$0xff] %v206_v11  ;;  %v2411_v19 = vld [vmem:[#allocation6 + $0x10] ss:$4 sm:$0x3]  ;;  %v196_v23 = vmul.f32 %v2407_v18, %v2407_v18  ;;  %s2313_s28 = smov 3  }
  0x15   :  { %308 = vmatpush.msra.mxu2 %v2309_v0  ;;  %328 = vmatpush.msra.mxu3 %v2309_v0  ;;  %227 = vst [vmem:[#allocation1 + $0x4] ss:$9 sm:$0xff] %v207_v13  ;;  %v2415_v20 = vld [vmem:[#allocation6 + $0x18] ss:$4 sm:$0x3]  ;;  %v197_v25 = vmul.f32 %v2411_v19, %v2411_v19  ;;  %s2314_s29 = smov 4  }
  0x16   :  { %242 = vmatpush.msra.mxu0 %v2309_v0  ;;  %262 = vmatpush.msra.mxu1 %v2309_v0  ;;  %229 = vst [vmem:[#allocation1 + $0x5] ss:$9 sm:$0xff] %v208_v14  ;;  %v2421_v22 = vld [vmem:[#allocation6 + $0x20] ss:$4 sm:$0x3]  ;;  %v198_v27 = vmul.f32 %v2415_v20, %v2415_v20  ;;  %s2315_s30 = smov 5  }
  0x17   :  { %309 = vmatpush.msra.mxu2 %v2309_v0  ;;  %329 = vmatpush.msra.mxu3 %v2309_v0  ;;  %231 = vst [vmem:[#allocation1 + $0x6] ss:$9 sm:$0xff] %v209_v15  ;;  %v2427_v24 = vld [vmem:[#allocation6 + $0x28] ss:$4 sm:$0x3]  ;;  %v199_v31 = vmul.f32 %v2421_v22, %v2421_v22  ;;  %s2316_s4 = smov 6  }
  0x18   :  { %243 = vmatpush.msra.mxu0 %v2309_v0  ;;  %263 = vmatpush.msra.mxu1 %v2309_v0  ;;  %233 = vst [vmem:[#allocation1 + $0x7] ss:$9 sm:$0xff] %v210_v16  ;;  %v2433_v26 = vld [vmem:[#allocation6 + $0x30] ss:$4 sm:$0x3]  ;;  %v200_v32 = vmul.f32 %v2427_v24, %v2427_v24  ;;  %s2317_s5 = smov 7  }
  0x19   :  { %310 = vmatpush.msra.mxu2 %v2309_v0  ;;  %330 = vmatpush.msra.mxu3 %v2309_v0  ;;  %v2443_v30 = vld [vmem:[#allocation6 + $0x38] ss:$4 sm:$0x3]  ;;  %v201_v33 = vmul.f32 %v2433_v26, %v2433_v26  ;;  %v101_v35 = vld [vmem:[#allocation6 + $0x2] ss:$4 sm:$0x3] }
  0x1a   :  { %244 = vmatpush.msra.mxu0 %v2309_v0  ;;  %264 = vmatpush.msra.mxu1 %v2309_v0  ;;  %v202_v34 = vmul.f32 %v2443_v30, %v2443_v30  ;;  %v103_v36 = vld [vmem:[#allocation6 + $0xa] ss:$4 sm:$0x3]  ;;  %v105_v37 = vld [vmem:[#allocation6 + $0x12] ss:$4 sm:$0x3]  ;;  %v345_v39 = vmul.f32 %v101_v35, %v101_v35 }
  0x1b   :  { %311 = vmatpush.msra.mxu2 %v2309_v0  ;;  %331 = vmatpush.msra.mxu3 %v2309_v0  ;;  %v107_v38 = vld [vmem:[#allocation6 + $0x1a] ss:$4 sm:$0x3]  ;;  %v109_v40 = vld [vmem:[#allocation6 + $0x22] ss:$4 sm:$0x3]  ;;  %v346_v41 = vmul.f32 %v103_v36, %v103_v36  ;;  %v347_v43 = vmul.f32 %v105_v37, %v105_v37 }
  0x1c   :  { %245 = vmatpush.msra.mxu0 %v2309_v0  ;;  %265 = vmatpush.msra.mxu1 %v2309_v0  ;;  %v111_v42 = vld [vmem:[#allocation6 + $0x2a] ss:$4 sm:$0x3]  ;;  %v113_v46 = vld [vmem:[#allocation6 + $0x32] ss:$4 sm:$0x3]  ;;  %v348_v47 = vmul.f32 %v107_v38, %v107_v38  ;;  %v349_v49 = vmul.f32 %v109_v40, %v109_v40 }
  0x1d   :  { %312 = vmatpush.msra.mxu2 %v2309_v0  ;;  %332 = vmatpush.msra.mxu3 %v2309_v0  ;;  %v115_v48 = vld [vmem:[#allocation6 + $0x3a] ss:$4 sm:$0x3]  ;;  %v350_v50 = vmul.f32 %v111_v42, %v111_v42  ;;  %v351_v51 = vmul.f32 %v113_v46, %v113_v46  ;;  %v117_v53 = vld [vmem:[#allocation6 + $0x3] ss:$4 sm:$0x3] }
  0x1e   :  { %246 = vmatpush.msra.mxu0 %v2309_v0  ;;  %266 = vmatpush.msra.mxu1 %v2309_v0  ;;  %v352_v52 = vmul.f32 %v115_v48, %v115_v48  ;;  %v119_v54 = vld [vmem:[#allocation6 + $0xb] ss:$4 sm:$0x3]  ;;  %v121_v55 = vld [vmem:[#allocation6 + $0x13] ss:$4 sm:$0x3]  ;;  %v421_v57 = vmul.f32 %v117_v53, %v117_v53 }
  0x1f   :  { %313 = vmatpush.msra.mxu2 %v2309_v0  ;;  %333 = vmatpush.msra.mxu3 %v2309_v0  ;;  %v2437_v28 = vld [vmem:[#allocation1] sm:$0xff]  ;;  %v2439_v29 = vld [vmem:[#allocation1 + $0x9] sm:$0xff]  ;;  %v422_v59 = vmul.f32 %v119_v54, %v119_v54  ;;  %v127_v60 = vld [vmem:[#allocation6 + $0x2b] ss:$4 sm:$0x3]  ;;  %v423_v61 = vmul.f32 %v121_v55, %v121_v55  ;;  %s2318_s6 = smov 9  }
  0x20   :  { %247 = vmatpush.msra.mxu0 %v2309_v0  ;;  %267 = vmatpush.msra.mxu1 %v2309_v0  ;;  %286 = vst [vmem:[#allocation1] ss:$9 sm:$0xff] %v195_v21  ;;  %v123_v56 = vld [vmem:[#allocation6 + $0x1b] ss:$4 sm:$0x3]  ;;  %v426_v5 = vmul.f32 %v127_v60, %v127_v60  ;;  %s2319_s7 = smov 10  }
  0x21   :  { %314 = vmatpush.msra.mxu2 %v2309_v0  ;;  %334 = vmatpush.msra.mxu3 %v2309_v0  ;;  %288 = vst [vmem:[#allocation1 + $0x1] ss:$9 sm:$0xff] %v196_v23  ;;  %v125_v58 = vld [vmem:[#allocation6 + $0x23] ss:$4 sm:$0x3]  ;;  %v424_v2 = vmul.f32 %v123_v56, %v123_v56  ;;  %s2320_s8 = smov 11  }
  0x22   :  { %248 = vmatpush.msra.mxu0 %v2309_v0  ;;  %268 = vmatpush.msra.mxu1 %v2309_v0  ;;  %290 = vst [vmem:[#allocation1 + $0x2] ss:$9 sm:$0xff] %v197_v25  ;;  %v129_v62 = vld [vmem:[#allocation6 + $0x33] ss:$4 sm:$0x3]  ;;  %v425_v4 = vmul.f32 %v125_v58, %v125_v58  ;;  %s2321_s9 = smov 12  }
  0x23   :  { %315 = vmatpush.msra.mxu2 %v2309_v0  ;;  %335 = vmatpush.msra.mxu3 %v2309_v0  ;;  %292 = vst [vmem:[#allocation1 + $0x3] ss:$9 sm:$0xff] %v198_v27  ;;  %v131_v3 = vld [vmem:[#allocation6 + $0x3b] ss:$4 sm:$0x3]  ;;  %v427_v6 = vmul.f32 %v129_v62, %v129_v62  ;;  %s2322_s10 = smov 13  }
  0x24   :  { %249 = vmatpush.msra.mxu0 %v2309_v0  ;;  %269 = vmatpush.msra.mxu1 %v2309_v0  ;;  %294 = vst [vmem:[#allocation1 + $0x4] ss:$9 sm:$0xff] %v199_v31  ;;  %v428_v7 = vmul.f32 %v131_v3, %v131_v3  ;;  %v2527_v8 = vld [vmem:[#allocation8] ss:$4 sm:$0x3]  ;;  %s2323_s11 = smov 14  }
  0x25   :  { %316 = vmatpush.msra.mxu2 %v2309_v0  ;;  %336 = vmatpush.msra.mxu3 %v2309_v0  ;;  %296 = vst [vmem:[#allocation1 + $0x5] ss:$9 sm:$0xff] %v200_v32  ;;  %v2531_v9 = vld [vmem:[#allocation8 + $0x8] ss:$4 sm:$0x3]  ;;  %v497_v12 = vmul.f32 %v2527_v8, %v2527_v8  ;;  %s2324_s12 = smov 15  }
  0x26   :  { %250 = vmatpush.msra.mxu0 %v2309_v0  ;;  %270 = vmatpush.msra.mxu1 %v2309_v0  ;;  %298 = vst [vmem:[#allocation1 + $0x6] ss:$9 sm:$0xff] %v201_v33  ;;  %v2535_v10 = vld [vmem:[#allocation8 + $0x10] ss:$4 sm:$0x3]  ;;  %v498_v14 = vmul.f32 %v2531_v9, %v2531_v9  ;;  %vm65_vm1 = vcmask 130048  }
  0x27   :  { %317 = vmatpush.msra.mxu2 %v2309_v0  ;;  %337 = vmatpush.msra.mxu3 %v2309_v0  ;;  %300 = vst [vmem:[#allocation1 + $0x7] ss:$9 sm:$0xff] %v202_v34  ;;  %v2537_v11 = vld [vmem:[#allocation8 + $0x18] ss:$4 sm:$0x3]  ;;  %v499_v16 = vmul.f32 %v2535_v10, %v2535_v10  ;;  %vm2067_vm2 = vcmask 15360  }
  0x28   :  { %251 = vmatpush.msra.mxu0 %v2309_v0  ;;  %271 = vmatpush.msra.mxu1 %v2309_v0  ;;  %v2543_v13 = vld [vmem:[#allocation8 + $0x20] ss:$4 sm:$0x3]  ;;  %v2549_v15 = vld [vmem:[#allocation8 + $0x28] ss:$4 sm:$0x3]  ;;  %v500_v27 = vmul.f32 %v2537_v11, %v2537_v11 }
  0x29   :  { %318 = vmatpush.msra.mxu2 %v2309_v0  ;;  %338 = vmatpush.msra.mxu3 %v2309_v0  ;;  %v2555_v25 = vld [vmem:[#allocation8 + $0x30] ss:$4 sm:$0x3]  ;;  %v502_v31 = vmul.f32 %v2549_v15, %v2549_v15  ;;  %v2585_v34 = vld [vmem:[#allocation8 + $0x1] ss:$4 sm:$0x3] }
  0x2a   :  { %252 = vmatpush.msra.mxu0 %v2309_v0  ;;  %272 = vmatpush.msra.mxu1 %v2309_v0  ;;  %v503_v32 = vmul.f32 %v2555_v25, %v2555_v25  ;;  %v2589_v35 = vld [vmem:[#allocation8 + $0x9] ss:$4 sm:$0x3]  ;;  %v2593_v36 = vld [vmem:[#allocation8 + $0x11] ss:$4 sm:$0x3]  ;;  %v573_v38 = vmul.f32 %v2585_v34, %v2585_v34 }
  0x2b   :  { %319 = vmatpush.msra.mxu2 %v2309_v0  ;;  %339 = vmatpush.msra.mxu3 %v2309_v0  ;;  %v2597_v37 = vld [vmem:[#allocation8 + $0x19] ss:$4 sm:$0x3]  ;;  %v574_v40 = vmul.f32 %v2589_v35, %v2589_v35  ;;  %v575_v42 = vmul.f32 %v2593_v36, %v2593_v36  ;;  %v2651_v53 = vld [vmem:[#allocation8 + $0xa] ss:$4 sm:$0x3] }
  0x2c   :  { %253 = vmatpush.msra.mxu0 %v2309_v0  ;;  %273 = vmatpush.msra.mxu1 %v2309_v0  ;;  %v576_v46 = vmul.f32 %v2597_v37, %v2597_v37  ;;  %v2655_v54 = vld [vmem:[#allocation8 + $0x12] ss:$4 sm:$0x3]  ;;  %v2657_v55 = vld [vmem:[#allocation8 + $0x1a] ss:$4 sm:$0x3]  ;;  %v650_v58 = vmul.f32 %v2651_v53, %v2651_v53 }
  0x2d   :  { %320 = vmatpush.msra.mxu2 %v2309_v0  ;;  %340 = vmatpush.msra.mxu3 %v2309_v0  ;;  %v651_v60 = vmul.f32 %v2655_v54, %v2655_v54  ;;  %vm2069_vm3 = vcmask 23552   ;;  %vm2071_vm4 = vcmask 31744   ;;  %vm2073_vm5 = vcmask 39936  }
  0x2e   :  { %380 = vmatpush.msrb.mxu0 %v2309_v0  ;;  %400 = vmatpush.msrb.mxu1 %v2309_v0  ;;  %v301_v44 = vld [vmem:[#allocation1] sm:$0xff]  ;;  %v302_v45 = vld [vmem:[#allocation1 + $0x9] sm:$0xff]  ;;  %vm2075_vm6 = vcmask 48128   ;;  %vm2077_vm7 = vcmask 56320   ;;  %vm2079_vm8 = vcmask 64512   ;;  %vm2081_vm9 = vcmask 72704  }
  0x2f   :  { %456 = vmatpush.msrb.mxu2 %v2309_v0  ;;  %476 = vmatpush.msrb.mxu3 %v2309_v0  ;;  %361 = vst [vmem:[#allocation1] ss:$9 sm:$0xff] %v345_v39  ;;  %v2603_v39 = vld [vmem:[#allocation8 + $0x21] ss:$4 sm:$0x3]  ;;  %vm2083_vm10 = vcmask 80896  }
  0x30   :  { %381 = vmatpush.msrb.mxu0 %v2309_v0  ;;  %401 = vmatpush.msrb.mxu1 %v2309_v0  ;;  %363 = vst [vmem:[#allocation1 + $0x1] ss:$9 sm:$0xff] %v346_v41  ;;  %v2609_v41 = vld [vmem:[#allocation8 + $0x29] ss:$4 sm:$0x3]  ;;  %v577_v48 = vmul.f32 %v2603_v39, %v2603_v39  ;;  %vm2085_vm11 = vcmask 89088  }
  0x31   :  { %457 = vmatpush.msrb.mxu2 %v2309_v0  ;;  %477 = vmatpush.msrb.mxu3 %v2309_v0  ;;  %365 = vst [vmem:[#allocation1 + $0x2] ss:$9 sm:$0xff] %v347_v43  ;;  %vm2087_vm12 = vcmask 97280   ;;  %vm2089_vm13 = vcmask 105472   ;;  %vm2091_vm14 = vcmask 113664   ;;  %vm2093_vm15 = vcmask 121856  }
  0x32   :  { %382 = vmatpush.msrb.mxu0 %v2309_v0  ;;  %402 = vmatpush.msrb.mxu1 %v2309_v0  ;;  %367 = vst [vmem:[#allocation1 + $0x3] ss:$9 sm:$0xff] %v348_v47  ;;  %v2621_v47 = vld [vmem:[#allocation8 + $0x39] ss:$4 sm:$0x3] }
  0x33   :  { %458 = vmatpush.msrb.mxu2 %v2309_v0  ;;  %478 = vmatpush.msrb.mxu3 %v2309_v0  ;;  %369 = vst [vmem:[#allocation1 + $0x4] ss:$9 sm:$0xff] %v349_v49  ;;  %v578_v49 = vmul.f32 %v2609_v41, %v2609_v41 }
  0x34   :  { %383 = vmatpush.msrb.mxu0 %v2309_v0  ;;  %403 = vmatpush.msrb.mxu1 %v2309_v0  ;;  %371 = vst [vmem:[#allocation1 + $0x5] ss:$9 sm:$0xff] %v350_v50 }
  0x35   :  { %459 = vmatpush.msrb.mxu2 %v2309_v0  ;;  %479 = vmatpush.msrb.mxu3 %v2309_v0  ;;  %373 = vst [vmem:[#allocation1 + $0x6] ss:$9 sm:$0xff] %v351_v51  ;;  %v580_v51 = vmul.f32 %v2621_v47, %v2621_v47 }
  0x36   :  { %384 = vmatpush.msrb.mxu0 %v2309_v0  ;;  %404 = vmatpush.msrb.mxu1 %v2309_v0  ;;  %375 = vst [vmem:[#allocation1 + $0x7] ss:$9 sm:$0xff] %v352_v52  ;;  %v2647_v52 = vld [vmem:[#allocation8 + $0x2] ss:$4 sm:$0x3] }
  0x37   :  { %460 = vmatpush.msrb.mxu2 %v2309_v0  ;;  %480 = vmatpush.msrb.mxu3 %v2309_v0  ;;  %v649_v56 = vmul.f32 %v2647_v52, %v2647_v52 }
  0x38   :  { %385 = vmatpush.msrb.mxu0 %v2309_v0  ;;  %405 = vmatpush.msrb.mxu1 %v2309_v0 }
  0x39   :  { %461 = vmatpush.msrb.mxu2 %v2309_v0  ;;  %481 = vmatpush.msrb.mxu3 %v2309_v0 }
  0x3a   :  { %386 = vmatpush.msrb.mxu0 %v2309_v0  ;;  %406 = vmatpush.msrb.mxu1 %v2309_v0 }
  0x3b   :  { %462 = vmatpush.msrb.mxu2 %v2309_v0  ;;  %482 = vmatpush.msrb.mxu3 %v2309_v0 }
  0x3c   :  { %387 = vmatpush.msrb.mxu0 %v2309_v0  ;;  %407 = vmatpush.msrb.mxu1 %v2309_v0 }
  0x3d   :  { %463 = vmatpush.msrb.mxu2 %v2309_v0  ;;  %483 = vmatpush.msrb.mxu3 %v2309_v0  ;;  %v376_v63 = vld [vmem:[#allocation1] sm:$0xff]  ;;  %v377_v1 = vld [vmem:[#allocation1 + $0x9] sm:$0xff] }
  0x3e   :  { %388 = vmatpush.msrb.mxu0 %v2309_v0  ;;  %408 = vmatpush.msrb.mxu1 %v2309_v0  ;;  %437 = vst [vmem:[#allocation1] ss:$9 sm:$0xff] %v421_v57  ;;  %v2663_v57 = vld [vmem:[#allocation8 + $0x22] ss:$4 sm:$0x3] }
  0x3f   :  { %464 = vmatpush.msrb.mxu2 %v2309_v0  ;;  %484 = vmatpush.msrb.mxu3 %v2309_v0  ;;  %439 = vst [vmem:[#allocation1 + $0x1] ss:$9 sm:$0xff] %v422_v59  ;;  %v2669_v59 = vld [vmem:[#allocation8 + $0x2a] ss:$4 sm:$0x3]  ;;  %v653_v3 = vmul.f32 %v2663_v57, %v2663_v57 }
  0x40   :  { %389 = vmatpush.msrb.mxu0 %v2309_v0  ;;  %409 = vmatpush.msrb.mxu1 %v2309_v0  ;;  %441 = vst [vmem:[#allocation1 + $0x2] ss:$9 sm:$0xff] %v423_v61 }
  0x41   :  { %465 = vmatpush.msrb.mxu2 %v2309_v0  ;;  %485 = vmatpush.msrb.mxu3 %v2309_v0  ;;  %443 = vst [vmem:[#allocation1 + $0x3] ss:$9 sm:$0xff] %v424_v2  ;;  %v2679_v2 = vld [vmem:[#allocation8 + $0x3a] ss:$4 sm:$0x3] }
  0x42   :  { %390 = vmatpush.msrb.mxu0 %v2309_v0  ;;  %410 = vmatpush.msrb.mxu1 %v2309_v0  ;;  %445 = vst [vmem:[#allocation1 + $0x4] ss:$9 sm:$0xff] %v425_v4  ;;  %v654_v4 = vmul.f32 %v2669_v59, %v2669_v59 }
  0x43   :  { %466 = vmatpush.msrb.mxu2 %v2309_v0  ;;  %486 = vmatpush.msrb.mxu3 %v2309_v0  ;;  %447 = vst [vmem:[#allocation1 + $0x5] ss:$9 sm:$0xff] %v426_v5 }
  0x44   :  { %391 = vmatpush.msrb.mxu0 %v2309_v0  ;;  %411 = vmatpush.msrb.mxu1 %v2309_v0  ;;  %449 = vst [vmem:[#allocation1 + $0x6] ss:$9 sm:$0xff] %v427_v6  ;;  %v656_v6 = vmul.f32 %v2679_v2, %v2679_v2 }
  0x45   :  { %467 = vmatpush.msrb.mxu2 %v2309_v0  ;;  %487 = vmatpush.msrb.mxu3 %v2309_v0  ;;  %451 = vst [vmem:[#allocation1 + $0x7] ss:$9 sm:$0xff] %v428_v7  ;;  %v2705_v7 = vld [vmem:[#allocation8 + $0x3] ss:$4 sm:$0x3] }
  0x46   :  { %321 = vmatmul.f32.vlgmr.msra.gmra.mxu2 %v301_v44  ;;  %341 = vmatmul.f32.vlgmr.msra.gmra.mxu3 %v302_v45  ;;  %v2615_v45 = vld [vmem:[#allocation8 + $0x31] ss:$4 sm:$0x3] }
  0x47   :  { %392 = vmatpush.msrb.mxu0 %v2309_v0  ;;  %412 = vmatpush.msrb.mxu1 %v2309_v0  ;;  %v579_v50 = vmul.f32 %v2615_v45, %v2615_v45 }
  0x48   :  { %468 = vmatpush.msrb.mxu2 %v2309_v0  ;;  %488 = vmatpush.msrb.mxu3 %v2309_v0 }
  0x49   :  { %393 = vmatpush.msrb.mxu0 %v2309_v0  ;;  %413 = vmatpush.msrb.mxu1 %v2309_v0 }
  0x4a   :  { %469 = vmatpush.msrb.mxu2 %v2309_v0  ;;  %489 = vmatpush.msrb.mxu3 %v2309_v0 }
  0x4b   :  { %254 = vmatmul.f32.vlgmr.msra.gmra.mxu0 %v2437_v28  ;;  %274 = vmatmul.f32.vlgmr.msra.gmra.mxu1 %v2439_v29  ;;  %v2559_v28 = vld [vmem:[#allocation8 + $0x38] ss:$4 sm:$0x3]  ;;  %v501_v29 = vmul.f32 %v2543_v13, %v2543_v13 }
  0x4c   :  { %394 = vmatpush.msrb.mxu0 %v2309_v0  ;;  %414 = vmatpush.msrb.mxu1 %v2309_v0  ;;  %v452_v21 = vld [vmem:[#allocation1] sm:$0xff]  ;;  %v453_v23 = vld [vmem:[#allocation1 + $0x9] sm:$0xff]  ;;  %v504_v33 = vmul.f32 %v2559_v28, %v2559_v28 }
  0x4d   :  { %470 = vmatpush.msrb.mxu2 %v2309_v0  ;;  %490 = vmatpush.msrb.mxu3 %v2309_v0  ;;  %513 = vst [vmem:[#allocation1] ss:$9 sm:$0xff] %v497_v12  ;;  %v2709_v12 = vld [vmem:[#allocation8 + $0xb] ss:$4 sm:$0x3] }
  0x4e   :  { %395 = vmatpush.msrb.mxu0 %v2309_v0  ;;  %415 = vmatpush.msrb.mxu1 %v2309_v0  ;;  %515 = vst [vmem:[#allocation1 + $0x1] ss:$9 sm:$0xff] %v498_v14  ;;  %v2713_v14 = vld [vmem:[#allocation8 + $0x13] ss:$4 sm:$0x3] }
  0x4f   :  { %471 = vmatpush.msrb.mxu2 %v2309_v0  ;;  %491 = vmatpush.msrb.mxu3 %v2309_v0  ;;  %517 = vst [vmem:[#allocation1 + $0x2] ss:$9 sm:$0xff] %v499_v16  ;;  %v2717_v16 = vld [vmem:[#allocation8 + $0x1b] ss:$4 sm:$0x3] }
  0x50   :  { %532 = vmatpush.msra.mxu0 %v2309_v0  ;;  %552 = vmatpush.msra.mxu1 %v2309_v0  ;;  %519 = vst [vmem:[#allocation1 + $0x3] ss:$9 sm:$0xff] %v500_v27  ;;  %v726_v27 = vmul.f32 %v2709_v12, %v2709_v12 }
  0x51   :  { %608 = vmatpush.msra.mxu2 %v2309_v0  ;;  %628 = vmatpush.msra.mxu3 %v2309_v0  ;;  %521 = vst [vmem:[#allocation1 + $0x4] ss:$9 sm:$0xff] %v501_v29  ;;  %v2729_v29 = vld [vmem:[#allocation8 + $0x2b] ss:$4 sm:$0x3] }
  0x52   :  { %533 = vmatpush.msra.mxu0 %v2309_v0  ;;  %553 = vmatpush.msra.mxu1 %v2309_v0  ;;  %523 = vst [vmem:[#allocation1 + $0x5] ss:$9 sm:$0xff] %v502_v31  ;;  %v727_v31 = vmul.f32 %v2713_v14, %v2713_v14 }
  0x53   :  { %609 = vmatpush.msra.mxu2 %v2309_v0  ;;  %629 = vmatpush.msra.mxu3 %v2309_v0  ;;  %525 = vst [vmem:[#allocation1 + $0x6] ss:$9 sm:$0xff] %v503_v32 }
  0x54   :  { %396 = vmatmul.f32.vlgmr.msrb.gmra.mxu0 %v376_v63  ;;  %416 = vmatmul.f32.vlgmr.msrb.gmra.mxu1 %v377_v1  ;;  %527 = vst [vmem:[#allocation1 + $0x7] ss:$9 sm:$0xff] %v504_v33  ;;  %v2675_v63 = vld [vmem:[#allocation8 + $0x32] ss:$4 sm:$0x3]  ;;  %v652_v1 = vmul.f32 %v2657_v55, %v2657_v55 }
  0x55   :  { %534 = vmatpush.msra.mxu0 %v2309_v0  ;;  %554 = vmatpush.msra.mxu1 %v2309_v0  ;;  %v655_v5 = vmul.f32 %v2675_v63, %v2675_v63 }
  0x56   :  { %610 = vmatpush.msra.mxu2 %v2309_v0  ;;  %630 = vmatpush.msra.mxu3 %v2309_v0 }
  0x57   :  { %535 = vmatpush.msra.mxu0 %v2309_v0  ;;  %555 = vmatpush.msra.mxu1 %v2309_v0 }
  0x58   :  { %472 = vmatmul.f32.vlgmr.msrb.gmra.mxu2 %v452_v21  ;;  %492 = vmatmul.f32.vlgmr.msrb.gmra.mxu3 %v453_v23  ;;  %v725_v21 = vmul.f32 %v2705_v7, %v2705_v7  ;;  %v2723_v23 = vld [vmem:[#allocation8 + $0x23] ss:$4 sm:$0x3] }
  0x59   :  { %611 = vmatpush.msra.mxu2 %v2309_v0  ;;  %631 = vmatpush.msra.mxu3 %v2309_v0 }
  0x5a   :  { %536 = vmatpush.msra.mxu0 %v2309_v0  ;;  %556 = vmatpush.msra.mxu1 %v2309_v0 }
  0x5b   :  { %612 = vmatpush.msra.mxu2 %v2309_v0  ;;  %632 = vmatpush.msra.mxu3 %v2309_v0  ;;  %v528_v43 = vld [vmem:[#allocation1] sm:$0xff]  ;;  %v529_v44 = vld [vmem:[#allocation1 + $0x9] sm:$0xff] }
  0x5c   :  { %537 = vmatpush.msra.mxu0 %v2309_v0  ;;  %557 = vmatpush.msra.mxu1 %v2309_v0  ;;  %589 = vst [vmem:[#allocation1] ss:$9 sm:$0xff] %v573_v38  ;;  %v2735_v38 = vld [vmem:[#allocation8 + $0x33] ss:$4 sm:$0x3] }
  0x5d   :  { %613 = vmatpush.msra.mxu2 %v2309_v0  ;;  %633 = vmatpush.msra.mxu3 %v2309_v0  ;;  %591 = vst [vmem:[#allocation1 + $0x1] ss:$9 sm:$0xff] %v574_v40  ;;  %v728_v40 = vmul.f32 %v2717_v16, %v2717_v16 }
  0x5e   :  { %538 = vmatpush.msra.mxu0 %v2309_v0  ;;  %558 = vmatpush.msra.mxu1 %v2309_v0  ;;  %593 = vst [vmem:[#allocation1 + $0x2] ss:$9 sm:$0xff] %v575_v42  ;;  %v2741_v42 = vld [vmem:[#allocation8 + $0x3b] ss:$4 sm:$0x3] }
  0x5f   :  { %614 = vmatpush.msra.mxu2 %v2309_v0  ;;  %634 = vmatpush.msra.mxu3 %v2309_v0  ;;  %595 = vst [vmem:[#allocation1 + $0x3] ss:$9 sm:$0xff] %v576_v46  ;;  %v731_v46 = vmul.f32 %v2735_v38, %v2735_v38 }
  0x60   :  { %539 = vmatpush.msra.mxu0 %v2309_v0  ;;  %559 = vmatpush.msra.mxu1 %v2309_v0  ;;  %597 = vst [vmem:[#allocation1 + $0x4] ss:$9 sm:$0xff] %v577_v48  ;;  %v732_v48 = vmul.f32 %v2741_v42, %v2741_v42 }
  0x61   :  { %615 = vmatpush.msra.mxu2 %v2309_v0  ;;  %635 = vmatpush.msra.mxu3 %v2309_v0  ;;  %599 = vst [vmem:[#allocation1 + $0x5] ss:$9 sm:$0xff] %v578_v49  ;;  %v805_v49 = vmul.f32 %v2527_v8, %v2403_v17 }
  0x62   :  { %540 = vmatpush.msra.mxu0 %v2309_v0  ;;  %560 = vmatpush.msra.mxu1 %v2309_v0  ;;  %601 = vst [vmem:[#allocation1 + $0x6] ss:$9 sm:$0xff] %v579_v50  ;;  %v806_v50 = vmul.f32 %v2531_v9, %v2407_v18 }
  0x63   :  { %616 = vmatpush.msra.mxu2 %v2309_v0  ;;  %636 = vmatpush.msra.mxu3 %v2309_v0  ;;  %603 = vst [vmem:[#allocation1 + $0x7] ss:$9 sm:$0xff] %v580_v51  ;;  %v807_v51 = vmul.f32 %v2535_v10, %v2411_v19 }
  0x64   :  { %541 = vmatpush.msra.mxu0 %v2309_v0  ;;  %561 = vmatpush.msra.mxu1 %v2309_v0 }
  0x65   :  { %617 = vmatpush.msra.mxu2 %v2309_v0  ;;  %637 = vmatpush.msra.mxu3 %v2309_v0 }
  0x66   :  { %542 = vmatpush.msra.mxu0 %v2309_v0  ;;  %562 = vmatpush.msra.mxu1 %v2309_v0 }
  0x67   :  { %618 = vmatpush.msra.mxu2 %v2309_v0  ;;  %638 = vmatpush.msra.mxu3 %v2309_v0 }
  0x68   :  { %543 = vmatpush.msra.mxu0 %v2309_v0  ;;  %563 = vmatpush.msra.mxu1 %v2309_v0 }
  0x69   :  { %619 = vmatpush.msra.mxu2 %v2309_v0  ;;  %639 = vmatpush.msra.mxu3 %v2309_v0 }
  0x6a   :  { %544 = vmatpush.msra.mxu0 %v2309_v0  ;;  %564 = vmatpush.msra.mxu1 %v2309_v0  ;;  %v604_v61 = vld [vmem:[#allocation1] sm:$0xff]  ;;  %v605_v62 = vld [vmem:[#allocation1 + $0x9] sm:$0xff] }
  0x6b   :  { %620 = vmatpush.msra.mxu2 %v2309_v0  ;;  %640 = vmatpush.msra.mxu3 %v2309_v0  ;;  %665 = vst [vmem:[#allocation1] ss:$9 sm:$0xff] %v649_v56 }
  0x6c   :  { %545 = vmatpush.msra.mxu0 %v2309_v0  ;;  %565 = vmatpush.msra.mxu1 %v2309_v0  ;;  %667 = vst [vmem:[#allocation1 + $0x1] ss:$9 sm:$0xff] %v650_v58 }
  0x6d   :  { %621 = vmatpush.msra.mxu2 %v2309_v0  ;;  %641 = vmatpush.msra.mxu3 %v2309_v0  ;;  %669 = vst [vmem:[#allocation1 + $0x2] ss:$9 sm:$0xff] %v651_v60  ;;  %v808_v60 = vmul.f32 %v2537_v11, %v2415_v20 }
  0x6e   :  { %546 = vmatpush.msra.mxu0 %v2309_v0  ;;  %566 = vmatpush.msra.mxu1 %v2309_v0  ;;  %671 = vst [vmem:[#allocation1 + $0x3] ss:$9 sm:$0xff] %v652_v1  ;;  %v811_v1 = vmul.f32 %v2555_v25, %v2433_v26 }
  0x6f   :  { %622 = vmatpush.msra.mxu2 %v2309_v0  ;;  %642 = vmatpush.msra.mxu3 %v2309_v0  ;;  %673 = vst [vmem:[#allocation1 + $0x4] ss:$9 sm:$0xff] %v653_v3  ;;  %v812_v3 = vmul.f32 %v2559_v28, %v2443_v30 }
  0x70   :  { %547 = vmatpush.msra.mxu0 %v2309_v0  ;;  %567 = vmatpush.msra.mxu1 %v2309_v0  ;;  %675 = vst [vmem:[#allocation1 + $0x5] ss:$9 sm:$0xff] %v654_v4  ;;  %v880_v4 = vmul.f32 %v2585_v34, %v2403_v17 }
  0x71   :  { %623 = vmatpush.msra.mxu2 %v2309_v0  ;;  %643 = vmatpush.msra.mxu3 %v2309_v0  ;;  %677 = vst [vmem:[#allocation1 + $0x6] ss:$9 sm:$0xff] %v655_v5  ;;  %v881_v5 = vmul.f32 %v2589_v35, %v2407_v18 }
  0x72   :  { %548 = vmatmul.f32.vlgmr.msra.gmra.mxu0 %v528_v43  ;;  %568 = vmatmul.f32.vlgmr.msra.gmra.mxu1 %v529_v44  ;;  %679 = vst [vmem:[#allocation1 + $0x7] ss:$9 sm:$0xff] %v656_v6  ;;  %v729_v43 = vmul.f32 %v2723_v23, %v2723_v23  ;;  %v730_v44 = vmul.f32 %v2729_v29, %v2729_v29 }
  0x73   :  { %684 = vmatpush.msrb.mxu0 %v2309_v0  ;;  %704 = vmatpush.msrb.mxu1 %v2309_v0  ;;  %v882_v6 = vmul.f32 %v2593_v36, %v2411_v19 }
  0x74   :  { %760 = vmatpush.msrb.mxu2 %v2309_v0  ;;  %780 = vmatpush.msrb.mxu3 %v2309_v0 }
  0x75   :  { %685 = vmatpush.msrb.mxu0 %v2309_v0  ;;  %705 = vmatpush.msrb.mxu1 %v2309_v0 }
  0x76   :  { %624 = vmatmul.f32.vlgmr.msra.gmra.mxu2 %v604_v61  ;;  %644 = vmatmul.f32.vlgmr.msra.gmra.mxu3 %v605_v62  ;;  %v809_v61 = vmul.f32 %v2543_v13, %v2421_v22  ;;  %v810_v62 = vmul.f32 %v2549_v15, %v2427_v24 }
  0x77   :  { %761 = vmatpush.msrb.mxu2 %v2309_v0  ;;  %781 = vmatpush.msrb.mxu3 %v2309_v0 }
  0x78   :  { %686 = vmatpush.msrb.mxu0 %v2309_v0  ;;  %706 = vmatpush.msrb.mxu1 %v2309_v0 }
  0x79   :  { %762 = vmatpush.msrb.mxu2 %v2309_v0  ;;  %782 = vmatpush.msrb.mxu3 %v2309_v0  ;;  %v680_v32 = vld [vmem:[#allocation1] sm:$0xff]  ;;  %v681_v33 = vld [vmem:[#allocation1 + $0x9] sm:$0xff] }
  0x7a   :  { %687 = vmatpush.msrb.mxu0 %v2309_v0  ;;  %707 = vmatpush.msrb.mxu1 %v2309_v0  ;;  %741 = vst [vmem:[#allocation1] ss:$9 sm:$0xff] %v725_v21 }
  0x7b   :  { %763 = vmatpush.msrb.mxu2 %v2309_v0  ;;  %783 = vmatpush.msrb.mxu3 %v2309_v0  ;;  %743 = vst [vmem:[#allocation1 + $0x1] ss:$9 sm:$0xff] %v726_v27 }
  0x7c   :  { %688 = vmatpush.msrb.mxu0 %v2309_v0  ;;  %708 = vmatpush.msrb.mxu1 %v2309_v0  ;;  %745 = vst [vmem:[#allocation1 + $0x2] ss:$9 sm:$0xff] %v727_v31  ;;  %v883_v31 = vmul.f32 %v2597_v37, %v2415_v20 }
  0x7d   :  { %764 = vmatpush.msrb.mxu2 %v2309_v0  ;;  %784 = vmatpush.msrb.mxu3 %v2309_v0  ;;  %747 = vst [vmem:[#allocation1 + $0x3] ss:$9 sm:$0xff] %v728_v40  ;;  %v886_v40 = vmul.f32 %v2615_v45, %v2433_v26 }
  0x7e   :  { %689 = vmatpush.msrb.mxu0 %v2309_v0  ;;  %709 = vmatpush.msrb.mxu1 %v2309_v0  ;;  %749 = vst [vmem:[#allocation1 + $0x4] ss:$9 sm:$0xff] %v729_v43  ;;  %v887_v43 = vmul.f32 %v2621_v47, %v2443_v30 }
  0x7f   :  { %765 = vmatpush.msrb.mxu2 %v2309_v0  ;;  %785 = vmatpush.msrb.mxu3 %v2309_v0  ;;  %751 = vst [vmem:[#allocation1 + $0x5] ss:$9 sm:$0xff] %v730_v44  ;;  %v955_v44 = vmul.f32 %v2647_v52, %v2403_v17 }
  0x80   :  { %690 = vmatpush.msrb.mxu0 %v2309_v0  ;;  %710 = vmatpush.msrb.mxu1 %v2309_v0  ;;  %753 = vst [vmem:[#allocation1 + $0x6] ss:$9 sm:$0xff] %v731_v46  ;;  %v956_v46 = vmul.f32 %v2651_v53, %v2407_v18  ;;  %v959_v18 = vmul.f32 %v2663_v57, %v2421_v22 }
  0x81   :  { %766 = vmatpush.msrb.mxu2 %v2309_v0  ;;  %786 = vmatpush.msrb.mxu3 %v2309_v0  ;;  %755 = vst [vmem:[#allocation1 + $0x7] ss:$9 sm:$0xff] %v732_v48  ;;  %v957_v48 = vmul.f32 %v2655_v54, %v2411_v19  ;;  %v960_v19 = vmul.f32 %v2669_v59, %v2427_v24 }
  0x82   :  { %691 = vmatpush.msrb.mxu0 %v2309_v0  ;;  %711 = vmatpush.msrb.mxu1 %v2309_v0 }
  0x83   :  { %767 = vmatpush.msrb.mxu2 %v2309_v0  ;;  %787 = vmatpush.msrb.mxu3 %v2309_v0 }
  0x84   :  { %692 = vmatpush.msrb.mxu0 %v2309_v0  ;;  %712 = vmatpush.msrb.mxu1 %v2309_v0 }
  0x85   :  { %768 = vmatpush.msrb.mxu2 %v2309_v0  ;;  %788 = vmatpush.msrb.mxu3 %v2309_v0 }
  0x86   :  { %693 = vmatpush.msrb.mxu0 %v2309_v0  ;;  %713 = vmatpush.msrb.mxu1 %v2309_v0 }
  0x87   :  { %769 = vmatpush.msrb.mxu2 %v2309_v0  ;;  %789 = vmatpush.msrb.mxu3 %v2309_v0 }
  0x88   :  { %694 = vmatpush.msrb.mxu0 %v2309_v0  ;;  %714 = vmatpush.msrb.mxu1 %v2309_v0  ;;  %v756_v56 = vld [vmem:[#allocation1] sm:$0xff]  ;;  %v757_v58 = vld [vmem:[#allocation1 + $0x9] sm:$0xff] }
  0x89   :  { %770 = vmatpush.msrb.mxu2 %v2309_v0  ;;  %790 = vmatpush.msrb.mxu3 %v2309_v0  ;;  %821 = vst [vmem:[#allocation1] ss:$9 sm:$0xff] %v805_v49 }
  0x8a   :  { %695 = vmatpush.msrb.mxu0 %v2309_v0  ;;  %715 = vmatpush.msrb.mxu1 %v2309_v0  ;;  %823 = vst [vmem:[#allocation1 + $0x1] ss:$9 sm:$0xff] %v806_v50  ;;  %v958_v50 = vmul.f32 %v2657_v55, %v2415_v20  ;;  %v961_v20 = vmul.f32 %v2675_v63, %v2433_v26 }
  0x8b   :  { %771 = vmatpush.msrb.mxu2 %v2309_v0  ;;  %791 = vmatpush.msrb.mxu3 %v2309_v0  ;;  %825 = vst [vmem:[#allocation1 + $0x2] ss:$9 sm:$0xff] %v807_v51 }
  0x8c   :  { %696 = vmatpush.msrb.mxu0 %v2309_v0  ;;  %716 = vmatpush.msrb.mxu1 %v2309_v0  ;;  %827 = vst [vmem:[#allocation1 + $0x3] ss:$9 sm:$0xff] %v808_v60 }
  0x8d   :  { %772 = vmatpush.msrb.mxu2 %v2309_v0  ;;  %792 = vmatpush.msrb.mxu3 %v2309_v0  ;;  %829 = vst [vmem:[#allocation1 + $0x4] ss:$9 sm:$0xff] %v809_v61 }
  0x8e   :  { %697 = vmatpush.msrb.mxu0 %v2309_v0  ;;  %717 = vmatpush.msrb.mxu1 %v2309_v0  ;;  %831 = vst [vmem:[#allocation1 + $0x5] ss:$9 sm:$0xff] %v810_v62  ;;  %v2167_v62 = vld [vmem:[#allocation6 + $0x18] ss:$4 sm:$0x3] }
  0x8f   :  { %773 = vmatpush.msrb.mxu2 %v2309_v0  ;;  %793 = vmatpush.msrb.mxu3 %v2309_v0  ;;  %833 = vst [vmem:[#allocation1 + $0x6] ss:$9 sm:$0xff] %v811_v1  ;;  %v1033_v1 = vmul.f32 %v2167_v62, %v2717_v16 }
  0x90   :  { %698 = vmatpush.msrb.mxu0 %v2309_v0  ;;  %718 = vmatpush.msrb.mxu1 %v2309_v0  ;;  %835 = vst [vmem:[#allocation1 + $0x7] ss:$9 sm:$0xff] %v812_v3  ;;  %v2168_v3 = vld [vmem:[#allocation6 + $0x20] ss:$4 sm:$0x3] }
  0x91   :  { %774 = vmatpush.msrb.mxu2 %v2309_v0  ;;  %794 = vmatpush.msrb.mxu3 %v2309_v0 }
  0x92   :  { %699 = vmatpush.msrb.mxu0 %v2309_v0  ;;  %719 = vmatpush.msrb.mxu1 %v2309_v0 }
  0x93   :  { %775 = vmatpush.msrb.mxu2 %v2309_v0  ;;  %795 = vmatpush.msrb.mxu3 %v2309_v0 }
  0x94   :  { %700 = vmatmul.f32.vlgmr.msrb.gmra.mxu0 %v680_v32  ;;  %720 = vmatmul.f32.vlgmr.msrb.gmra.mxu1 %v681_v33  ;;  %v884_v32 = vmul.f32 %v2603_v39, %v2421_v22  ;;  %v885_v33 = vmul.f32 %v2609_v41, %v2427_v24  ;;  %v962_v22 = vmul.f32 %v2679_v2, %v2443_v30  ;;  %v2164_v24 = vld [vmem:[#allocation6] ss:$4 sm:$0x3]  ;;  %v2165_v30 = vld [vmem:[#allocation6 + $0x8] ss:$4 sm:$0x3] }
  0x95   :  { %776 = vmatmul.f32.vlgmr.msrb.gmra.mxu2 %v756_v56  ;;  %796 = vmatmul.f32.vlgmr.msrb.gmra.mxu3 %v757_v58  ;;  %v1030_v26 = vmul.f32 %v2164_v24, %v2705_v7  ;;  %v1031_v51 = vmul.f32 %v2165_v30, %v2709_v12  ;;  %v2166_v56 = vld [vmem:[#allocation6 + $0x10] ss:$4 sm:$0x3] }
  0x96   :  { %840 = vmatpush.msra.mxu0 %v2309_v0  ;;  %860 = vmatpush.msra.mxu1 %v2309_v0  ;;  %v1032_v58 = vmul.f32 %v2166_v56, %v2713_v14 }
  0x97   :  { %915 = vmatpush.msra.mxu2 %v2309_v0  ;;  %935 = vmatpush.msra.mxu3 %v2309_v0  ;;  %v2827_v21 = vld [vmem:[#allocation1] sm:$0xff]  ;;  %v2829_v27 = vld [vmem:[#allocation1 + $0x9] sm:$0xff] }
  0x98   :  { %841 = vmatpush.msra.mxu0 %v2309_v0  ;;  %861 = vmatpush.msra.mxu1 %v2309_v0  ;;  %896 = vst [vmem:[#allocation1] ss:$9 sm:$0xff] %v880_v4  ;;  %v1034_v4 = vmul.f32 %v2168_v3, %v2723_v23 }
  0x99   :  { %916 = vmatpush.msra.mxu2 %v2309_v0  ;;  %936 = vmatpush.msra.mxu3 %v2309_v0  ;;  %898 = vst [vmem:[#allocation1 + $0x1] ss:$9 sm:$0xff] %v881_v5  ;;  %v2169_v5 = vld [vmem:[#allocation6 + $0x28] ss:$4 sm:$0x3] }
  0x9a   :  { %842 = vmatpush.msra.mxu0 %v2309_v0  ;;  %862 = vmatpush.msra.mxu1 %v2309_v0  ;;  %900 = vst [vmem:[#allocation1 + $0x2] ss:$9 sm:$0xff] %v882_v6  ;;  %v1035_v6 = vmul.f32 %v2169_v5, %v2729_v29 }
  0x9b   :  { %917 = vmatpush.msra.mxu2 %v2309_v0  ;;  %937 = vmatpush.msra.mxu3 %v2309_v0  ;;  %902 = vst [vmem:[#allocation1 + $0x3] ss:$9 sm:$0xff] %v883_v31  ;;  %v2170_v31 = vld [vmem:[#allocation6 + $0x30] ss:$4 sm:$0x3] }
  0x9c   :  { %843 = vmatpush.msra.mxu0 %v2309_v0  ;;  %863 = vmatpush.msra.mxu1 %v2309_v0  ;;  %904 = vst [vmem:[#allocation1 + $0x4] ss:$9 sm:$0xff] %v884_v32  ;;  %v1036_v32 = vmul.f32 %v2170_v31, %v2735_v38 }
  0x9d   :  { %918 = vmatpush.msra.mxu2 %v2309_v0  ;;  %938 = vmatpush.msra.mxu3 %v2309_v0  ;;  %906 = vst [vmem:[#allocation1 + $0x5] ss:$9 sm:$0xff] %v885_v33  ;;  %v2171_v33 = vld [vmem:[#allocation6 + $0x38] ss:$4 sm:$0x3] }
  0x9e   :  { %844 = vmatpush.msra.mxu0 %v2309_v0  ;;  %864 = vmatpush.msra.mxu1 %v2309_v0  ;;  %908 = vst [vmem:[#allocation1 + $0x6] ss:$9 sm:$0xff] %v886_v40  ;;  %v1037_v40 = vmul.f32 %v2171_v33, %v2741_v42 }
  0x9f   :  { %919 = vmatpush.msra.mxu2 %v2309_v0  ;;  %939 = vmatpush.msra.mxu3 %v2309_v0  ;;  %910 = vst [vmem:[#allocation1 + $0x7] ss:$9 sm:$0xff] %v887_v43  ;;  %v2959_v43 = vld [vmem:[#allocation6 + $0x1] ss:$4 sm:$0x3] }
  0xa0   :  { %845 = vmatpush.msra.mxu0 %v2309_v0  ;;  %865 = vmatpush.msra.mxu1 %v2309_v0 }
  0xa1   :  { %920 = vmatpush.msra.mxu2 %v2309_v0  ;;  %940 = vmatpush.msra.mxu3 %v2309_v0 }
  0xa2   :  { %846 = vmatpush.msra.mxu0 %v2309_v0  ;;  %866 = vmatpush.msra.mxu1 %v2309_v0 }
  0xa3   :  { %921 = vmatpush.msra.mxu2 %v2309_v0  ;;  %941 = vmatpush.msra.mxu3 %v2309_v0 }
  0xa4   :  { %847 = vmatpush.msra.mxu0 %v2309_v0  ;;  %867 = vmatpush.msra.mxu1 %v2309_v0 }
  0xa5   :  { %922 = vmatpush.msra.mxu2 %v2309_v0  ;;  %942 = vmatpush.msra.mxu3 %v2309_v0 }
  0xa6   :  { %848 = vmatpush.msra.mxu0 %v2309_v0  ;;  %868 = vmatpush.msra.mxu1 %v2309_v0  ;;  %v911_v49 = vld [vmem:[#allocation1] sm:$0xff]  ;;  %v912_v17 = vld [vmem:[#allocation1 + $0x9] sm:$0xff] }
  0xa7   :  { %923 = vmatpush.msra.mxu2 %v2309_v0  ;;  %943 = vmatpush.msra.mxu3 %v2309_v0  ;;  %971 = vst [vmem:[#allocation1] ss:$9 sm:$0xff] %v955_v44  ;;  %v1105_v44 = vmul.f32 %v2959_v43, %v2527_v8 }
  0xa8   :  { %849 = vmatpush.msra.mxu0 %v2309_v0  ;;  %869 = vmatpush.msra.mxu1 %v2309_v0  ;;  %973 = vst [vmem:[#allocation1 + $0x1] ss:$9 sm:$0xff] %v956_v46  ;;  %v2963_v46 = vld [vmem:[#allocation6 + $0x9] ss:$4 sm:$0x3] }
  0xa9   :  { %924 = vmatpush.msra.mxu2 %v2309_v0  ;;  %944 = vmatpush.msra.mxu3 %v2309_v0  ;;  %975 = vst [vmem:[#allocation1 + $0x2] ss:$9 sm:$0xff] %v957_v48  ;;  %v1106_v48 = vmul.f32 %v2963_v46, %v2531_v9  ;;  %v2979_v9 = vld [vmem:[#allocation6 + $0x21] ss:$4 sm:$0x3] }
  0xaa   :  { %850 = vmatpush.msra.mxu0 %v2309_v0  ;;  %870 = vmatpush.msra.mxu1 %v2309_v0  ;;  %977 = vst [vmem:[#allocation1 + $0x3] ss:$9 sm:$0xff] %v958_v50  ;;  %v2973_v50 = vld [vmem:[#allocation6 + $0x19] ss:$4 sm:$0x3] }
  0xab   :  { %925 = vmatpush.msra.mxu2 %v2309_v0  ;;  %945 = vmatpush.msra.mxu3 %v2309_v0  ;;  %979 = vst [vmem:[#allocation1 + $0x4] ss:$9 sm:$0xff] %v959_v18  ;;  %v1108_v8 = vmul.f32 %v2973_v50, %v2537_v11  ;;  %v2985_v18 = vld [vmem:[#allocation6 + $0x29] ss:$4 sm:$0x3]  ;;  %v1183_v30 = vmul.f32 %v2973_v50, %v2597_v37 }
  0xac   :  { %851 = vmatpush.msra.mxu0 %v2309_v0  ;;  %871 = vmatpush.msra.mxu1 %v2309_v0  ;;  %981 = vst [vmem:[#allocation1 + $0x5] ss:$9 sm:$0xff] %v960_v19  ;;  %v1110_v19 = vmul.f32 %v2985_v18, %v2549_v15  ;;  %v2991_v11 = vld [vmem:[#allocation6 + $0x31] ss:$4 sm:$0x3]  ;;  %v1335_v5 = vmul.f32 %v2985_v18, %v2729_v29 }
  0xad   :  { %926 = vmatpush.msra.mxu2 %v2309_v0  ;;  %946 = vmatpush.msra.mxu3 %v2309_v0  ;;  %983 = vst [vmem:[#allocation1 + $0x6] ss:$9 sm:$0xff] %v961_v20  ;;  %v2997_v20 = vld [vmem:[#allocation6 + $0x39] ss:$4 sm:$0x3] }
  0xae   :  { %852 = vmatpush.msra.mxu0 %v2309_v0  ;;  %872 = vmatpush.msra.mxu1 %v2309_v0  ;;  %985 = vst [vmem:[#allocation1 + $0x7] ss:$9 sm:$0xff] %v962_v22  ;;  %v1112_v15 = vmul.f32 %v2997_v20, %v2559_v28  ;;  %v1181_v28 = vmul.f32 %v2963_v46, %v2589_v35 }
  0xaf   :  { %927 = vmatpush.msra.mxu2 %v2309_v0  ;;  %947 = vmatpush.msra.mxu3 %v2309_v0  ;;  %v1185_v35 = vmul.f32 %v2985_v18, %v2609_v41  ;;  %v1187_v37 = vmul.f32 %v2997_v20, %v2621_v47  ;;  %v1256_v41 = vmul.f32 %v2963_v46, %v2651_v53 }
  0xb0   :  { %853 = vmatpush.msra.mxu0 %v2309_v0  ;;  %873 = vmatpush.msra.mxu1 %v2309_v0  ;;  %v1259_v53 = vmul.f32 %v2979_v9, %v2663_v57  ;;  %v1262_v57 = vmul.f32 %v2997_v20, %v2679_v2  ;;  %v1330_v2 = vmul.f32 %v2959_v43, %v2705_v7 }
  0xb1   :  { %928 = vmatpush.msra.mxu2 %v2309_v0  ;;  %948 = vmatpush.msra.mxu3 %v2309_v0 }
  0xb2   :  { %854 = vmatpush.msra.mxu0 %v2309_v0  ;;  %874 = vmatpush.msra.mxu1 %v2309_v0 }
  0xb3   :  { %929 = vmatpush.msra.mxu2 %v2309_v0  ;;  %949 = vmatpush.msra.mxu3 %v2309_v0 }
  0xb4   :  { %855 = vmatpush.msra.mxu0 %v2309_v0  ;;  %875 = vmatpush.msra.mxu1 %v2309_v0 }
  0xb5   :  { %930 = vmatpush.msra.mxu2 %v2309_v0  ;;  %950 = vmatpush.msra.mxu3 %v2309_v0  ;;  %v2918_v60 = vld [vmem:[#allocation1] sm:$0xff]  ;;  %v2920_v61 = vld [vmem:[#allocation1 + $0x9] sm:$0xff] }
  0xb6   :  { %931 = vmatmul.f32.vlgmr.msra.gmra.mxu2 %v911_v49  ;;  %951 = vmatmul.f32.vlgmr.msra.gmra.mxu3 %v912_v17  ;;  %1046 = vst [vmem:[#allocation1] ss:$9 sm:$0xff] %v1030_v26  ;;  %v2967_v49 = vld [vmem:[#allocation6 + $0x11] ss:$4 sm:$0x3] }
  0xb7   :  { %990 = vmatpush.msrb.mxu0 %v2309_v0  ;;  %1010 = vmatpush.msrb.mxu1 %v2309_v0  ;;  %1048 = vst [vmem:[#allocation1 + $0x1] ss:$9 sm:$0xff] %v1031_v51  ;;  %v1182_v22 = vmul.f32 %v2967_v49, %v2593_v36  ;;  %v1186_v36 = vmul.f32 %v2991_v11, %v2615_v45 }
  0xb8   :  { %1065 = vmatpush.msrb.mxu2 %v2309_v0  ;;  %1085 = vmatpush.msrb.mxu3 %v2309_v0  ;;  %1050 = vst [vmem:[#allocation1 + $0x2] ss:$9 sm:$0xff] %v1032_v58  ;;  %v1257_v45 = vmul.f32 %v2967_v49, %v2655_v54  ;;  %v1258_v51 = vmul.f32 %v2973_v50, %v2657_v55 }
  0xb9   :  { %991 = vmatpush.msrb.mxu0 %v2309_v0  ;;  %1011 = vmatpush.msrb.mxu1 %v2309_v0  ;;  %1052 = vst [vmem:[#allocation1 + $0x3] ss:$9 sm:$0xff] %v1033_v1  ;;  %v1260_v54 = vmul.f32 %v2985_v18, %v2669_v59  ;;  %v1261_v55 = vmul.f32 %v2991_v11, %v2675_v63 }
  0xba   :  { %1066 = vmatpush.msrb.mxu2 %v2309_v0  ;;  %1086 = vmatpush.msrb.mxu3 %v2309_v0  ;;  %1054 = vst [vmem:[#allocation1 + $0x4] ss:$9 sm:$0xff] %v1034_v4  ;;  %v1333_v1 = vmul.f32 %v2973_v50, %v2717_v16  ;;  %v1336_v16 = vmul.f32 %v2991_v11, %v2735_v38 }
  0xbb   :  { %992 = vmatpush.msrb.mxu0 %v2309_v0  ;;  %1012 = vmatpush.msrb.mxu1 %v2309_v0  ;;  %1056 = vst [vmem:[#allocation1 + $0x5] ss:$9 sm:$0xff] %v1035_v6  ;;  %v2310_v6 = vmov 0.0  }
  0xbc   :  { %1067 = vmatpush.msrb.mxu2 %v2309_v0  ;;  %1087 = vmatpush.msrb.mxu3 %v2309_v0  ;;  %1058 = vst [vmem:[#allocation1 + $0x6] ss:$9 sm:$0xff] %v1036_v32 }
  0xbd   :  { %993 = vmatpush.msrb.mxu0 %v2309_v0  ;;  %1013 = vmatpush.msrb.mxu1 %v2309_v0  ;;  %1060 = vst [vmem:[#allocation1 + $0x7] ss:$9 sm:$0xff] %v1037_v40 }
  0xbe   :  { %1068 = vmatpush.msrb.mxu2 %v2309_v0  ;;  %1088 = vmatpush.msrb.mxu3 %v2309_v0  ;;  %68 = vst.msk [vmem:[#allocation3] sm:$0xff] %vm67_vm0, %v2310_v6 }
  0xbf   :  { %994 = vmatpush.msrb.mxu0 %v2309_v0  ;;  %1014 = vmatpush.msrb.mxu1 %v2309_v0  ;;  %66 = vst.msk [vmem:[#allocation2] sm:$0xff] %vm65_vm1, %v2310_v6 }
  0xc0   :  { %1069 = vmatpush.msrb.mxu2 %v2309_v0  ;;  %1089 = vmatpush.msrb.mxu3 %v2309_v0 }
  0xc1   :  { %995 = vmatpush.msrb.mxu0 %v2309_v0  ;;  %1015 = vmatpush.msrb.mxu1 %v2309_v0 }
  0xc2   :  { %1070 = vmatpush.msrb.mxu2 %v2309_v0  ;;  %1090 = vmatpush.msrb.mxu3 %v2309_v0 }
  0xc3   :  { %996 = vmatpush.msrb.mxu0 %v2309_v0  ;;  %1016 = vmatpush.msrb.mxu1 %v2309_v0 }
  0xc4   :  { %1071 = vmatpush.msrb.mxu2 %v2309_v0  ;;  %1091 = vmatpush.msrb.mxu3 %v2309_v0  ;;  %v1062_v17 = vld [vmem:[#allocation1 + $0x9] sm:$0xff] }
  0xc5   :  { %997 = vmatpush.msrb.mxu0 %v2309_v0  ;;  %1017 = vmatpush.msrb.mxu1 %v2309_v0 }
  0xc6   :  { %1072 = vmatpush.msrb.mxu2 %v2309_v0  ;;  %1092 = vmatpush.msrb.mxu3 %v2309_v0 }
  0xc7   :  { %998 = vmatpush.msrb.mxu0 %v2309_v0  ;;  %1018 = vmatpush.msrb.mxu1 %v2309_v0 }
  0xc8   :  { %1073 = vmatpush.msrb.mxu2 %v2309_v0  ;;  %1093 = vmatpush.msrb.mxu3 %v2309_v0  ;;  %v255_v59 = vpop.f32.mrf.mxu0  ;;  %v275_v63 = vpop.f32.mrf.mxu1 }
  0xc9   :  { %999 = vmatpush.msrb.mxu0 %v2309_v0  ;;  %1019 = vmatpush.msrb.mxu1 %v2309_v0  ;;  %v322_v56 = vpop.f32.mrf.mxu2  ;;  %v342_v58 = vpop.f32.mrf.mxu3 }
  0xca   :  { %1074 = vmatpush.msrb.mxu2 %v2309_v0  ;;  %1094 = vmatpush.msrb.mxu3 %v2309_v0 }
  0xcb   :  { %1000 = vmatpush.msrb.mxu0 %v2309_v0  ;;  %1020 = vmatpush.msrb.mxu1 %v2309_v0 }
  0xcc   :  { %1075 = vmatpush.msrb.mxu2 %v2309_v0  ;;  %1095 = vmatpush.msrb.mxu3 %v2309_v0 }
  0xcd   :  { %1001 = vmatpush.msrb.mxu0 %v2309_v0  ;;  %1021 = vmatpush.msrb.mxu1 %v2309_v0 }
  0xce   :  { %1076 = vmatpush.msrb.mxu2 %v2309_v0  ;;  %1096 = vmatpush.msrb.mxu3 %v2309_v0 }
  0xcf   :  { %856 = vmatmul.f32.vlgmr.msra.gmra.mxu0 %v2827_v21  ;;  %876 = vmatmul.f32.vlgmr.msra.gmra.mxu1 %v2829_v27  ;;  %v1107_v21 = vmul.f32 %v2967_v49, %v2535_v10  ;;  %v1061_v27 = vld [vmem:[#allocation1] sm:$0xff]  ;;  %v1109_v10 = vmul.f32 %v2979_v9, %v2543_v13  ;;  %v1111_v13 = vmul.f32 %v2991_v11, %v2555_v25  ;;  %v3195_v11 = vld [vmem:[#allocation8 + $0x8] ss:$4 sm:$0x3] }
  0xd0   :  { %1002 = vmatpush.msrb.mxu0 %v2309_v0  ;;  %1022 = vmatpush.msrb.mxu1 %v2309_v0  ;;  %1121 = vst [vmem:[#allocation1] ss:$9 sm:$0xff] %v1105_v44  ;;  %v1180_v25 = vmul.f32 %v2959_v43, %v2585_v34  ;;  %v1184_v34 = vmul.f32 %v2979_v9, %v2603_v39 }
  0xd1   :  { %1077 = vmatpush.msrb.mxu2 %v2309_v0  ;;  %1097 = vmatpush.msrb.mxu3 %v2309_v0  ;;  %1123 = vst [vmem:[#allocation1 + $0x1] ss:$9 sm:$0xff] %v1106_v48  ;;  %v1255_v39 = vmul.f32 %v2959_v43, %v2647_v52  ;;  %v397_v3 = vpop.f32.mrf.mxu0  ;;  %v417_v4 = vpop.f32.mrf.mxu1 }
  0xd2   :  { %1003 = vmatpush.msrb.mxu0 %v2309_v0  ;;  %1023 = vmatpush.msrb.mxu1 %v2309_v0  ;;  %1125 = vst [vmem:[#allocation1 + $0x2] ss:$9 sm:$0xff] %v1107_v21  ;;  %v418_v32 = vadd.f32 %v417_v4, %v397_v3 }
  0xd3   :  { %1078 = vmatpush.msrb.mxu2 %v2309_v0  ;;  %1098 = vmatpush.msrb.mxu3 %v2309_v0  ;;  %1127 = vst [vmem:[#allocation1 + $0x3] ss:$9 sm:$0xff] %v1108_v8 }
  0xd4   :  { %1004 = vmatpush.msrb.mxu0 %v2309_v0  ;;  %1024 = vmatpush.msrb.mxu1 %v2309_v0  ;;  %1129 = vst [vmem:[#allocation1 + $0x4] ss:$9 sm:$0xff] %v1109_v10  ;;  %v3189_v10 = vld [vmem:[#allocation8] ss:$4 sm:$0x3] }
  0xd5   :  { %1079 = vmatpush.msrb.mxu2 %v2309_v0  ;;  %1099 = vmatpush.msrb.mxu3 %v2309_v0  ;;  %1131 = vst [vmem:[#allocation1 + $0x5] ss:$9 sm:$0xff] %v1110_v19  ;;  %v3193_v19 = vld [vmem:[#allocation6 + $0xa] ss:$4 sm:$0x3] }
  0xd6   :  { %1005 = vmatpush.msrb.mxu0 %v2309_v0  ;;  %1025 = vmatpush.msrb.mxu1 %v2309_v0  ;;  %1133 = vst [vmem:[#allocation1 + $0x6] ss:$9 sm:$0xff] %v1111_v13  ;;  %v1406_v13 = vmul.f32 %v3195_v11, %v3193_v19 }
  0xd7   :  { %1080 = vmatpush.msrb.mxu2 %v2309_v0  ;;  %1100 = vmatpush.msrb.mxu3 %v2309_v0  ;;  %1135 = vst [vmem:[#allocation1 + $0x7] ss:$9 sm:$0xff] %v1112_v15 }
  0xd8   :  { %1006 = vmatmul.f32.vlgmr.msrb.gmra.mxu0 %v2918_v60  ;;  %1026 = vmatmul.f32.vlgmr.msrb.gmra.mxu1 %v2920_v61  ;;  %v1331_v60 = vmul.f32 %v2963_v46, %v2709_v12  ;;  %v1332_v61 = vmul.f32 %v2967_v49, %v2713_v14  ;;  %v1334_v12 = vmul.f32 %v2979_v9, %v2723_v23  ;;  %v3187_v9 = vld [vmem:[#allocation6 + $0x2] ss:$4 sm:$0x3] }
  0xd9   :  { %1081 = vmatmul.f32.vlgmr.msrb.gmra.mxu2 %v1061_v27  ;;  %1101 = vmatmul.f32.vlgmr.msrb.gmra.mxu3 %v1062_v17  ;;  %v276_v14 = vadd.f32 %v275_v63, %v255_v59  ;;  %v1337_v23 = vmul.f32 %v2997_v20, %v2741_v42  ;;  %v1405_v18 = vmul.f32 %v3189_v10, %v3187_v9  ;;  %v3239_v63 = vld [vmem:[#allocation6 + $0x3a] ss:$4 sm:$0x3] }
  0xda   :  { %1140 = vmatpush.msra.mxu0 %v2309_v0  ;;  %1160 = vmatpush.msra.mxu1 %v2309_v0 }
  0xdb   :  { %1215 = vmatpush.msra.mxu2 %v2309_v0  ;;  %1235 = vmatpush.msra.mxu3 %v2309_v0  ;;  %v323_v29 = vadd.f32 %v322_v56, %v276_v14  ;;  %v473_v38 = vpop.f32.mrf.mxu2  ;;  %v493_v42 = vpop.f32.mrf.mxu3  ;;  %v3278_v14 = vld [vmem:[#allocation8 + $0x11] ss:$4 sm:$0x3] }
  0xdc   :  { %1141 = vmatpush.msra.mxu0 %v2309_v0  ;;  %1161 = vmatpush.msra.mxu1 %v2309_v0  ;;  %v494_v44 = vadd.f32 %v493_v42, %v473_v38  ;;  %v3300_v42 = vld [vmem:[#allocation8 + $0x29] ss:$4 sm:$0x3] }
  0xdd   :  { %1216 = vmatpush.msra.mxu2 %v2309_v0  ;;  %1236 = vmatpush.msra.mxu3 %v2309_v0  ;;  %v343_v31 = vadd.f32 %v342_v58, %v323_v29  ;;  %v801_v58 = vld [vmem:[#allocation3] sm:$0xff]  ;;  %v3294_v29 = vld [vmem:[#allocation8 + $0x21] ss:$4 sm:$0x3] }
  0xde   :  { %1142 = vmatpush.msra.mxu0 %v2309_v0  ;;  %1162 = vmatpush.msra.mxu1 %v2309_v0  ;;  %v3031_v24 = vld [vmem:[#allocation1] sm:$0xff]  ;;  %v3033_v26 = vld [vmem:[#allocation1 + $0x9] sm:$0xff] }
  0xdf   :  { %1217 = vmatpush.msra.mxu2 %v2309_v0  ;;  %1237 = vmatpush.msra.mxu3 %v2309_v0  ;;  %1196 = vst [vmem:[#allocation1] ss:$9 sm:$0xff] %v1180_v25  ;;  %v420_v43 = vadd.f32 %v418_v32, %v343_v31  ;;  %v3306_v32 = vld [vmem:[#allocation8 + $0x31] ss:$4 sm:$0x3] }
  0xe0   :  { %1143 = vmatpush.msra.mxu0 %v2309_v0  ;;  %1163 = vmatpush.msra.mxu1 %v2309_v0  ;;  %1198 = vst [vmem:[#allocation1 + $0x1] ss:$9 sm:$0xff] %v1181_v28  ;;  %v3201_v28 = vld [vmem:[#allocation6 + $0x12] ss:$4 sm:$0x3] }
  0xe1   :  { %1218 = vmatpush.msra.mxu2 %v2309_v0  ;;  %1238 = vmatpush.msra.mxu3 %v2309_v0  ;;  %1200 = vst [vmem:[#allocation1 + $0x2] ss:$9 sm:$0xff] %v1182_v22  ;;  %v496_v21 = vadd.f32 %v494_v44, %v420_v43  ;;  %v3203_v22 = vld [vmem:[#allocation8 + $0x10] ss:$4 sm:$0x3]  ;;  %v1482_v3 = vmul.f32 %v3278_v14, %v3201_v28 }
  0xe2   :  { %1144 = vmatpush.msra.mxu0 %v2309_v0  ;;  %1164 = vmatpush.msra.mxu1 %v2309_v0  ;;  %1202 = vst [vmem:[#allocation1 + $0x3] ss:$9 sm:$0xff] %v1183_v30  ;;  %v3209_v30 = vld [vmem:[#allocation8 + $0x18] ss:$4 sm:$0x3] }
  0xe3   :  { %1219 = vmatpush.msra.mxu2 %v2309_v0  ;;  %1239 = vmatpush.msra.mxu3 %v2309_v0  ;;  %1204 = vst [vmem:[#allocation1 + $0x4] ss:$9 sm:$0xff] %v1184_v34  ;;  %v3332_v44 = vld [vmem:[#allocation8 + $0x2] ss:$4 sm:$0x3] }
  0xe4   :  { %1145 = vmatpush.msra.mxu0 %v2309_v0  ;;  %1165 = vmatpush.msra.mxu1 %v2309_v0  ;;  %1206 = vst [vmem:[#allocation1 + $0x5] ss:$9 sm:$0xff] %v1185_v35  ;;  %v3215_v35 = vld [vmem:[#allocation6 + $0x22] ss:$4 sm:$0x3] }
  0xe5   :  { %1220 = vmatpush.msra.mxu2 %v2309_v0  ;;  %1240 = vmatpush.msra.mxu3 %v2309_v0  ;;  %1208 = vst [vmem:[#allocation1 + $0x6] ss:$9 sm:$0xff] %v1186_v36  ;;  %v3217_v36 = vld [vmem:[#allocation8 + $0x20] ss:$4 sm:$0x3]  ;;  %v1484_v38 = vmul.f32 %v3294_v29, %v3215_v35 }
  0xe6   :  { %1146 = vmatpush.msra.mxu0 %v2309_v0  ;;  %1166 = vmatpush.msra.mxu1 %v2309_v0  ;;  %1210 = vst [vmem:[#allocation1 + $0x7] ss:$9 sm:$0xff] %v1187_v37  ;;  %v1409_v37 = vmul.f32 %v3217_v36, %v3215_v35 }
  0xe7   :  { %1221 = vmatpush.msra.mxu2 %v2309_v0  ;;  %1241 = vmatpush.msra.mxu3 %v2309_v0 }
  0xe8   :  { %1147 = vmatpush.msra.mxu0 %v2309_v0  ;;  %1167 = vmatpush.msra.mxu1 %v2309_v0 }
  0xe9   :  { %1222 = vmatpush.msra.mxu2 %v2309_v0  ;;  %1242 = vmatpush.msra.mxu3 %v2309_v0 }
  0xea   :  { %1148 = vmatpush.msra.mxu0 %v2309_v0  ;;  %1168 = vmatpush.msra.mxu1 %v2309_v0 }
  0xeb   :  { %1223 = vmatpush.msra.mxu2 %v2309_v0  ;;  %1243 = vmatpush.msra.mxu3 %v2309_v0 }
  0xec   :  { %1149 = vmatpush.msra.mxu0 %v2309_v0  ;;  %1169 = vmatpush.msra.mxu1 %v2309_v0 }
  0xed   :  { %1224 = vmatpush.msra.mxu2 %v2309_v0  ;;  %1244 = vmatpush.msra.mxu3 %v2309_v0  ;;  %v3081_v47 = vld [vmem:[#allocation1] sm:$0xff]  ;;  %v3083_v52 = vld [vmem:[#allocation1 + $0x9] sm:$0xff] }
  0xee   :  { %1150 = vmatpush.msra.mxu0 %v2309_v0  ;;  %1170 = vmatpush.msra.mxu1 %v2309_v0  ;;  %1271 = vst [vmem:[#allocation1] ss:$9 sm:$0xff] %v1255_v39 }
  0xef   :  { %1225 = vmatpush.msra.mxu2 %v2309_v0  ;;  %1245 = vmatpush.msra.mxu3 %v2309_v0  ;;  %1273 = vst [vmem:[#allocation1 + $0x1] ss:$9 sm:$0xff] %v1256_v41  ;;  %v549_v33 = vpop.f32.mrf.mxu0  ;;  %v569_v40 = vpop.f32.mrf.mxu1  ;;  %v3223_v41 = vld [vmem:[#allocation6 + $0x2a] ss:$4 sm:$0x3] }
  0xf0   :  { %1151 = vmatpush.msra.mxu0 %v2309_v0  ;;  %1171 = vmatpush.msra.mxu1 %v2309_v0  ;;  %1275 = vst [vmem:[#allocation1 + $0x2] ss:$9 sm:$0xff] %v1257_v45  ;;  %v570_v46 = vadd.f32 %v569_v40, %v549_v33  ;;  %v3225_v45 = vld [vmem:[#allocation8 + $0x28] ss:$4 sm:$0x3]  ;;  %v1485_v31 = vmul.f32 %v3300_v42, %v3223_v41 }
  0xf1   :  { %1226 = vmatpush.msra.mxu2 %v2309_v0  ;;  %1246 = vmatpush.msra.mxu3 %v2309_v0  ;;  %1277 = vst [vmem:[#allocation1 + $0x3] ss:$9 sm:$0xff] %v1258_v51  ;;  %v3312_v40 = vld [vmem:[#allocation8 + $0x39] ss:$4 sm:$0x3] }
  0xf2   :  { %1152 = vmatpush.msra.mxu0 %v2309_v0  ;;  %1172 = vmatpush.msra.mxu1 %v2309_v0  ;;  %1279 = vst [vmem:[#allocation1 + $0x4] ss:$9 sm:$0xff] %v1259_v53  ;;  %v572_v8 = vadd.f32 %v570_v46, %v496_v21  ;;  %v3231_v53 = vld [vmem:[#allocation6 + $0x32] ss:$4 sm:$0x3]  ;;  %v1487_v43 = vmul.f32 %v3312_v40, %v3239_v63 }
  0xf3   :  { %1227 = vmatpush.msra.mxu2 %v2309_v0  ;;  %1247 = vmatpush.msra.mxu3 %v2309_v0  ;;  %1281 = vst [vmem:[#allocation1 + $0x5] ss:$9 sm:$0xff] %v1260_v54  ;;  %v3233_v54 = vld [vmem:[#allocation8 + $0x30] ss:$4 sm:$0x3]  ;;  %v1486_v33 = vmul.f32 %v3306_v32, %v3231_v53  ;;  %v1555_v46 = vmul.f32 %v3332_v44, %v3187_v9 }
  0xf4   :  { %1153 = vmatpush.msra.mxu0 %v2309_v0  ;;  %1173 = vmatpush.msra.mxu1 %v2309_v0  ;;  %1283 = vst [vmem:[#allocation1 + $0x6] ss:$9 sm:$0xff] %v1261_v55  ;;  %v1411_v55 = vmul.f32 %v3233_v54, %v3231_v53  ;;  %v3344_v21 = vld [vmem:[#allocation8 + $0x12] ss:$4 sm:$0x3] }
  0xf5   :  { %1228 = vmatpush.msra.mxu2 %v2309_v0  ;;  %1248 = vmatpush.msra.mxu3 %v2309_v0  ;;  %1285 = vst [vmem:[#allocation1 + $0x7] ss:$9 sm:$0xff] %v1262_v57 }
  0xf6   :  { %1154 = vmatpush.msra.mxu0 %v2309_v0  ;;  %1174 = vmatpush.msra.mxu1 %v2309_v0 }
  0xf7   :  { %1229 = vmatpush.msra.mxu2 %v2309_v0  ;;  %1249 = vmatpush.msra.mxu3 %v2309_v0 }
  0xf8   :  { %1155 = vmatpush.msra.mxu0 %v2309_v0  ;;  %1175 = vmatpush.msra.mxu1 %v2309_v0 }
  0xf9   :  { %1230 = vmatpush.msra.mxu2 %v2309_v0  ;;  %1250 = vmatpush.msra.mxu3 %v2309_v0  ;;  %v625_v48 = vpop.f32.mrf.mxu2  ;;  %v645_v49 = vpop.f32.mrf.mxu3 }
  0xfa   :  { %1156 = vmatmul.f32.vlgmr.msra.gmra.mxu0 %v3031_v24  ;;  %1176 = vmatmul.f32.vlgmr.msra.gmra.mxu1 %v3033_v26  ;;  %v646_v50 = vadd.f32 %v645_v49, %v625_v48  ;;  %v1407_v24 = vmul.f32 %v3203_v22, %v3201_v28  ;;  %v3207_v26 = vld [vmem:[#allocation6 + $0x1a] ss:$4 sm:$0x3]  ;;  %v3338_v48 = vld [vmem:[#allocation8 + $0xa] ss:$4 sm:$0x3] }
  0xfb   :  { %1290 = vmatpush.msrb.mxu0 %v2309_v0  ;;  %1310 = vmatpush.msrb.mxu1 %v2309_v0  ;;  %v1408_v34 = vmul.f32 %v3209_v30, %v3207_v26  ;;  %v1556_v49 = vmul.f32 %v3338_v48, %v3193_v19 }
  0xfc   :  { %1365 = vmatpush.msrb.mxu2 %v2309_v0  ;;  %1385 = vmatpush.msrb.mxu3 %v2309_v0  ;;  %v3131_v7 = vld [vmem:[#allocation1] sm:$0xff]  ;;  %v3133_v62 = vld [vmem:[#allocation1 + $0x9] sm:$0xff]  ;;  %v648_v39 = vadd.f32 %v646_v50, %v572_v8 }
  0xfd   :  { %1291 = vmatpush.msrb.mxu0 %v2309_v0  ;;  %1311 = vmatpush.msrb.mxu1 %v2309_v0  ;;  %1346 = vst [vmem:[#allocation1] ss:$9 sm:$0xff] %v1330_v2  ;;  %v3241_v2 = vld [vmem:[#allocation8 + $0x38] ss:$4 sm:$0x3] }
  0xfe   :  { %1366 = vmatpush.msrb.mxu2 %v2309_v0  ;;  %1386 = vmatpush.msrb.mxu3 %v2309_v0  ;;  %1348 = vst [vmem:[#allocation1 + $0x1] ss:$9 sm:$0xff] %v1331_v60  ;;  %v1412_v56 = vmul.f32 %v3241_v2, %v3239_v63  ;;  %v3354_v8 = vld [vmem:[#allocation8 + $0x1a] ss:$4 sm:$0x3] }
  0xff   :  { %1292 = vmatpush.msrb.mxu0 %v2309_v0  ;;  %1312 = vmatpush.msrb.mxu1 %v2309_v0  ;;  %1350 = vst [vmem:[#allocation1 + $0x2] ss:$9 sm:$0xff] %v1332_v61 }
 0x100   :  { %1367 = vmatpush.msrb.mxu2 %v2309_v0  ;;  %1387 = vmatpush.msrb.mxu3 %v2309_v0  ;;  %1352 = vst [vmem:[#allocation1 + $0x3] ss:$9 sm:$0xff] %v1333_v1  ;;  %v3274_v1 = vld [vmem:[#allocation8 + $0x9] ss:$4 sm:$0x3] }
 0x101   :  { %1293 = vmatpush.msrb.mxu0 %v2309_v0  ;;  %1313 = vmatpush.msrb.mxu1 %v2309_v0  ;;  %1354 = vst [vmem:[#allocation1 + $0x4] ss:$9 sm:$0xff] %v1334_v12  ;;  %v1481_v12 = vmul.f32 %v3274_v1, %v3193_v19 }
 0x102   :  { %1368 = vmatpush.msrb.mxu2 %v2309_v0  ;;  %1388 = vmatpush.msrb.mxu3 %v2309_v0  ;;  %1356 = vst [vmem:[#allocation1 + $0x5] ss:$9 sm:$0xff] %v1335_v5 }
 0x103   :  { %1294 = vmatpush.msrb.mxu0 %v2309_v0  ;;  %1314 = vmatpush.msrb.mxu1 %v2309_v0  ;;  %1358 = vst [vmem:[#allocation1 + $0x6] ss:$9 sm:$0xff] %v1336_v16  ;;  %v3288_v16 = vld [vmem:[#allocation8 + $0x19] ss:$4 sm:$0x3] }
 0x104   :  { %1369 = vmatpush.msrb.mxu2 %v2309_v0  ;;  %1389 = vmatpush.msrb.mxu3 %v2309_v0  ;;  %1360 = vst [vmem:[#allocation1 + $0x7] ss:$9 sm:$0xff] %v1337_v23  ;;  %v1483_v23 = vmul.f32 %v3288_v16, %v3207_v26 }
 0x105   :  { %1295 = vmatpush.msrb.mxu0 %v2309_v0  ;;  %1315 = vmatpush.msrb.mxu1 %v2309_v0 }
 0x106   :  { %1370 = vmatpush.msrb.mxu2 %v2309_v0  ;;  %1390 = vmatpush.msrb.mxu3 %v2309_v0 }
 0x107   :  { %1296 = vmatpush.msrb.mxu0 %v2309_v0  ;;  %1316 = vmatpush.msrb.mxu1 %v2309_v0 }
 0x108   :  { %1371 = vmatpush.msrb.mxu2 %v2309_v0  ;;  %1391 = vmatpush.msrb.mxu3 %v2309_v0 }
 0x109   :  { %1297 = vmatpush.msrb.mxu0 %v2309_v0  ;;  %1317 = vmatpush.msrb.mxu1 %v2309_v0 }
 0x10a   :  { %1372 = vmatpush.msrb.mxu2 %v2309_v0  ;;  %1392 = vmatpush.msrb.mxu3 %v2309_v0 }
 0x10b   :  { %1298 = vmatpush.msrb.mxu0 %v2309_v0  ;;  %1318 = vmatpush.msrb.mxu1 %v2309_v0  ;;  %v1361_v20 = vld [vmem:[#allocation1] sm:$0xff]  ;;  %v1362_v15 = vld [vmem:[#allocation1 + $0x9] sm:$0xff] }
 0x10c   :  { %1373 = vmatpush.msrb.mxu2 %v2309_v0  ;;  %1393 = vmatpush.msrb.mxu3 %v2309_v0  ;;  %1421 = vst [vmem:[#allocation1] ss:$9 sm:$0xff] %v1405_v18  ;;  %v1558_v18 = vmul.f32 %v3354_v8, %v3207_v26 }
 0x10d   :  { %1231 = vmatmul.f32.vlgmr.msra.gmra.mxu2 %v3081_v47  ;;  %1251 = vmatmul.f32.vlgmr.msra.gmra.mxu3 %v3083_v52  ;;  %v1410_v47 = vmul.f32 %v3225_v45, %v3223_v41  ;;  %1423 = vst [vmem:[#allocation1 + $0x1] ss:$9 sm:$0xff] %v1406_v13  ;;  %v3360_v13 = vld [vmem:[#allocation8 + $0x22] ss:$4 sm:$0x3] }
 0x10e   :  { %1299 = vmatpush.msrb.mxu0 %v2309_v0  ;;  %1319 = vmatpush.msrb.mxu1 %v2309_v0  ;;  %1425 = vst [vmem:[#allocation1 + $0x2] ss:$9 sm:$0xff] %v1407_v24  ;;  %v3372_v24 = vld [vmem:[#allocation8 + $0x32] ss:$4 sm:$0x3] }
 0x10f   :  { %1374 = vmatpush.msrb.mxu2 %v2309_v0  ;;  %1394 = vmatpush.msrb.mxu3 %v2309_v0  ;;  %1427 = vst [vmem:[#allocation1 + $0x3] ss:$9 sm:$0xff] %v1408_v34  ;;  %v1561_v34 = vmul.f32 %v3372_v24, %v3231_v53 }
 0x110   :  { %1300 = vmatpush.msrb.mxu0 %v2309_v0  ;;  %1320 = vmatpush.msrb.mxu1 %v2309_v0  ;;  %1429 = vst [vmem:[#allocation1 + $0x4] ss:$9 sm:$0xff] %v1409_v37  ;;  %v3378_v37 = vld [vmem:[#allocation8 + $0x3a] ss:$4 sm:$0x3] }
 0x111   :  { %1375 = vmatpush.msrb.mxu2 %v2309_v0  ;;  %1395 = vmatpush.msrb.mxu3 %v2309_v0  ;;  %v701_v27 = vpop.f32.mrf.mxu0  ;;  %v721_v17 = vpop.f32.mrf.mxu1  ;;  %1431 = vst [vmem:[#allocation1 + $0x5] ss:$9 sm:$0xff] %v1410_v47  ;;  %v3398_v47 = vld [vmem:[#allocation8 + $0x3] ss:$4 sm:$0x3] }
 0x112   :  { %1301 = vmatpush.msrb.mxu0 %v2309_v0  ;;  %1321 = vmatpush.msrb.mxu1 %v2309_v0  ;;  %v722_v25 = vadd.f32 %v721_v17, %v701_v27  ;;  %1433 = vst [vmem:[#allocation1 + $0x6] ss:$9 sm:$0xff] %v1411_v55  ;;  %v1557_v27 = vmul.f32 %v3344_v21, %v3201_v28 }
 0x113   :  { %1376 = vmatpush.msrb.mxu2 %v2309_v0  ;;  %1396 = vmatpush.msrb.mxu3 %v2309_v0  ;;  %1435 = vst [vmem:[#allocation1 + $0x7] ss:$9 sm:$0xff] %v1412_v56  ;;  %v3410_v56 = vld [vmem:[#allocation8 + $0x13] ss:$4 sm:$0x3] }
 0x114   :  { %1302 = vmatpush.msrb.mxu0 %v2309_v0  ;;  %1322 = vmatpush.msrb.mxu1 %v2309_v0  ;;  %v724_v57 = vadd.f32 %v722_v25, %v648_v39  ;;  %v1562_v39 = vmul.f32 %v3378_v37, %v3239_v63 }
 0x115   :  { %1377 = vmatpush.msrb.mxu2 %v2309_v0  ;;  %1397 = vmatpush.msrb.mxu3 %v2309_v0 }
 0x116   :  { %1303 = vmatpush.msrb.mxu0 %v2309_v0  ;;  %1323 = vmatpush.msrb.mxu1 %v2309_v0 }
 0x117   :  { %1378 = vmatpush.msrb.mxu2 %v2309_v0  ;;  %1398 = vmatpush.msrb.mxu3 %v2309_v0 }
 0x118   :  { %1304 = vmatpush.msrb.mxu0 %v2309_v0  ;;  %1324 = vmatpush.msrb.mxu1 %v2309_v0  ;;  %v777_v52 = vpop.f32.mrf.mxu2  ;;  %v797_v51 = vpop.f32.mrf.mxu3 }
 0x119   :  { %1379 = vmatpush.msrb.mxu2 %v2309_v0  ;;  %1399 = vmatpush.msrb.mxu3 %v2309_v0  ;;  %v798_v59 = vadd.f32 %v797_v51, %v777_v52  ;;  %v1630_v52 = vmul.f32 %v3398_v47, %v3187_v9  ;;  %v3404_v51 = vld [vmem:[#allocation8 + $0xb] ss:$4 sm:$0x3] }
 0x11a   :  { %1305 = vmatpush.msrb.mxu0 %v2309_v0  ;;  %1325 = vmatpush.msrb.mxu1 %v2309_v0  ;;  %v3284_v4 = vld [vmem:[#allocation1] sm:$0xff]  ;;  %v3286_v5 = vld [vmem:[#allocation1 + $0x9] sm:$0xff]  ;;  %v1631_v55 = vmul.f32 %v3404_v51, %v3193_v19 }
 0x11b   :  { %1380 = vmatpush.msrb.mxu2 %v2309_v0  ;;  %1400 = vmatpush.msrb.mxu3 %v2309_v0  ;;  %v800_v60 = vadd.f32 %v798_v59, %v724_v57  ;;  %1498 = vst [vmem:[#allocation1 + $0x1] ss:$9 sm:$0xff] %v1481_v12  ;;  %v3420_v19 = vld [vmem:[#allocation8 + $0x1b] ss:$4 sm:$0x3] }
 0x11c   :  { %1306 = vmatmul.f32.vlgmr.msrb.gmra.mxu0 %v3131_v7  ;;  %1326 = vmatmul.f32.vlgmr.msrb.gmra.mxu1 %v3133_v62  ;;  %v3270_v7 = vld [vmem:[#allocation8 + $0x1] ss:$4 sm:$0x3]  ;;  %1500 = vst [vmem:[#allocation1 + $0x2] ss:$9 sm:$0xff] %v1482_v3 }
 0x11d   :  { %1381 = vmatmul.f32.vlgmr.msrb.gmra.mxu2 %v1361_v20  ;;  %1401 = vmatmul.f32.vlgmr.msrb.gmra.mxu3 %v1362_v15  ;;  %v802_v61 = vadd.f32 %v801_v58, %v800_v60  ;;  %v1480_v62 = vmul.f32 %v3270_v7, %v3187_v9  ;;  %1502 = vst [vmem:[#allocation1 + $0x3] ss:$9 sm:$0xff] %v1483_v23  ;;  %v3366_v15 = vld [vmem:[#allocation8 + $0x2a] ss:$4 sm:$0x3] }
 0x11e   :  { %1440 = vmatpush.msra.mxu0 %v2309_v0  ;;  %1460 = vmatpush.msra.mxu1 %v2309_v0  ;;  %1504 = vst [vmem:[#allocation1 + $0x4] ss:$9 sm:$0xff] %v1484_v38  ;;  %v1559_v20 = vmul.f32 %v3360_v13, %v3215_v35  ;;  %v1560_v25 = vmul.f32 %v3366_v15, %v3223_v41  ;;  %v3432_v3 = vld [vmem:[#allocation8 + $0x2b] ss:$4 sm:$0x3] }
 0x11f   :  { %1515 = vmatpush.msra.mxu2 %v2309_v0  ;;  %1535 = vmatpush.msra.mxu3 %v2309_v0  ;;  %804 = vst.msk [vmem:[#allocation3] sm:$0xff] %vm67_vm0, %v802_v61  ;;  %v1632_v9 = vmul.f32 %v3410_v56, %v3201_v28  ;;  %v1633_v61 = vmul.f32 %v3420_v19, %v3207_v26  ;;  %v3467_v38 = vld [vmem:[#allocation6 + $0x3] ss:$4 sm:$0x3] }
 0x120   :  { %1441 = vmatpush.msra.mxu0 %v2309_v0  ;;  %1461 = vmatpush.msra.mxu1 %v2309_v0  ;;  %1496 = vst [vmem:[#allocation1] ss:$9 sm:$0xff] %v1480_v62  ;;  %v3426_v62 = vld [vmem:[#allocation8 + $0x23] ss:$4 sm:$0x3]  ;;  %v1635_v26 = vmul.f32 %v3432_v3, %v3223_v41 }
 0x121   :  { %1516 = vmatpush.msra.mxu2 %v2309_v0  ;;  %1536 = vmatpush.msra.mxu3 %v2309_v0  ;;  %1506 = vst [vmem:[#allocation1 + $0x5] ss:$9 sm:$0xff] %v1485_v31  ;;  %v1634_v28 = vmul.f32 %v3426_v62, %v3215_v35  ;;  %v1705_v31 = vmul.f32 %v3467_v38, %v3189_v10 }
 0x122   :  { %1442 = vmatpush.msra.mxu0 %v2309_v0  ;;  %1462 = vmatpush.msra.mxu1 %v2309_v0  ;;  %1508 = vst [vmem:[#allocation1 + $0x6] ss:$9 sm:$0xff] %v1486_v33  ;;  %v3471_v33 = vld [vmem:[#allocation6 + $0xb] ss:$4 sm:$0x3] }
 0x123   :  { %1517 = vmatpush.msra.mxu2 %v2309_v0  ;;  %1537 = vmatpush.msra.mxu3 %v2309_v0  ;;  %1510 = vst [vmem:[#allocation1 + $0x7] ss:$9 sm:$0xff] %v1487_v43  ;;  %v1706_v43 = vmul.f32 %v3471_v33, %v3195_v11 }
 0x124   :  { %1443 = vmatpush.msra.mxu0 %v2309_v0  ;;  %1463 = vmatpush.msra.mxu1 %v2309_v0 }
 0x125   :  { %1518 = vmatpush.msra.mxu2 %v2309_v0  ;;  %1538 = vmatpush.msra.mxu3 %v2309_v0 }
 0x126   :  { %1444 = vmatpush.msra.mxu0 %v2309_v0  ;;  %1464 = vmatpush.msra.mxu1 %v2309_v0 }
 0x127   :  { %1519 = vmatpush.msra.mxu2 %v2309_v0  ;;  %1539 = vmatpush.msra.mxu3 %v2309_v0 }
 0x128   :  { %1445 = vmatpush.msra.mxu0 %v2309_v0  ;;  %1465 = vmatpush.msra.mxu1 %v2309_v0 }
 0x129   :  { %1520 = vmatpush.msra.mxu2 %v2309_v0  ;;  %1540 = vmatpush.msra.mxu3 %v2309_v0 }
 0x12a   :  { %1446 = vmatpush.msra.mxu0 %v2309_v0  ;;  %1466 = vmatpush.msra.mxu1 %v2309_v0  ;;  %v3350_v17 = vld [vmem:[#allocation1] sm:$0xff]  ;;  %v3352_v50 = vld [vmem:[#allocation1 + $0x9] sm:$0xff] }
 0x12b   :  { %1521 = vmatpush.msra.mxu2 %v2309_v0  ;;  %1541 = vmatpush.msra.mxu3 %v2309_v0  ;;  %1571 = vst [vmem:[#allocation1] ss:$9 sm:$0xff] %v1555_v46  ;;  %v3477_v46 = vld [vmem:[#allocation6 + $0x13] ss:$4 sm:$0x3] }
 0x12c   :  { %1447 = vmatpush.msra.mxu0 %v2309_v0  ;;  %1467 = vmatpush.msra.mxu1 %v2309_v0  ;;  %1573 = vst [vmem:[#allocation1 + $0x1] ss:$9 sm:$0xff] %v1556_v49  ;;  %v1707_v49 = vmul.f32 %v3477_v46, %v3203_v22 }
 0x12d   :  { %1522 = vmatpush.msra.mxu2 %v2309_v0  ;;  %1542 = vmatpush.msra.mxu3 %v2309_v0  ;;  %1575 = vst [vmem:[#allocation1 + $0x2] ss:$9 sm:$0xff] %v1557_v27 }
 0x12e   :  { %1448 = vmatpush.msra.mxu0 %v2309_v0  ;;  %1468 = vmatpush.msra.mxu1 %v2309_v0  ;;  %1577 = vst [vmem:[#allocation1 + $0x3] ss:$9 sm:$0xff] %v1558_v18  ;;  %v3483_v18 = vld [vmem:[#allocation6 + $0x1b] ss:$4 sm:$0x3] }
 0x12f   :  { %1523 = vmatpush.msra.mxu2 %v2309_v0  ;;  %1543 = vmatpush.msra.mxu3 %v2309_v0  ;;  %1579 = vst [vmem:[#allocation1 + $0x4] ss:$9 sm:$0xff] %v1559_v20  ;;  %v1708_v11 = vmul.f32 %v3483_v18, %v3209_v30  ;;  %v3501_v30 = vld [vmem:[#allocation6 + $0x33] ss:$4 sm:$0x3] }
 0x130   :  { %1449 = vmatpush.msra.mxu0 %v2309_v0  ;;  %1469 = vmatpush.msra.mxu1 %v2309_v0  ;;  %1581 = vst [vmem:[#allocation1 + $0x5] ss:$9 sm:$0xff] %v1560_v25  ;;  %v3507_v25 = vld [vmem:[#allocation6 + $0x3b] ss:$4 sm:$0x3] }
 0x131   :  { %1524 = vmatpush.msra.mxu2 %v2309_v0  ;;  %1544 = vmatpush.msra.mxu3 %v2309_v0  ;;  %1583 = vst [vmem:[#allocation1 + $0x6] ss:$9 sm:$0xff] %v1561_v34 }
 0x132   :  { %1450 = vmatpush.msra.mxu0 %v2309_v0  ;;  %1470 = vmatpush.msra.mxu1 %v2309_v0  ;;  %1585 = vst [vmem:[#allocation1 + $0x7] ss:$9 sm:$0xff] %v1562_v39  ;;  %v1781_v39 = vmul.f32 %v3471_v33, %v3274_v1 }
 0x133   :  { %1525 = vmatpush.msra.mxu2 %v2309_v0  ;;  %1545 = vmatpush.msra.mxu3 %v2309_v0 }
 0x134   :  { %1451 = vmatpush.msra.mxu0 %v2309_v0  ;;  %1471 = vmatpush.msra.mxu1 %v2309_v0 }
 0x135   :  { %1526 = vmatpush.msra.mxu2 %v2309_v0  ;;  %1546 = vmatpush.msra.mxu3 %v2309_v0 }
 0x136   :  { %1452 = vmatpush.msra.mxu0 %v2309_v0  ;;  %1472 = vmatpush.msra.mxu1 %v2309_v0 }
 0x137   :  { %1527 = vmatpush.msra.mxu2 %v2309_v0  ;;  %1547 = vmatpush.msra.mxu3 %v2309_v0 }
 0x138   :  { %1453 = vmatpush.msra.mxu0 %v2309_v0  ;;  %1473 = vmatpush.msra.mxu1 %v2309_v0 }
 0x139   :  { %1528 = vmatpush.msra.mxu2 %v2309_v0  ;;  %1548 = vmatpush.msra.mxu3 %v2309_v0  ;;  %v932_v57 = vpop.f32.mrf.mxu2  ;;  %v952_v59 = vpop.f32.mrf.mxu3  ;;  %v3416_v58 = vld [vmem:[#allocation1] sm:$0xff]  ;;  %v3418_v60 = vld [vmem:[#allocation1 + $0x9] sm:$0xff] }
 0x13a   :  { %1454 = vmatpush.msra.mxu0 %v2309_v0  ;;  %1474 = vmatpush.msra.mxu1 %v2309_v0  ;;  %1646 = vst [vmem:[#allocation1] ss:$9 sm:$0xff] %v1630_v52  ;;  %v953_v12 = vadd.f32 %v952_v59, %v932_v57  ;;  %v1782_v52 = vmul.f32 %v3477_v46, %v3278_v14 }
 0x13b   :  { %1529 = vmatpush.msra.mxu2 %v2309_v0  ;;  %1549 = vmatpush.msra.mxu3 %v2309_v0  ;;  %1648 = vst [vmem:[#allocation1 + $0x1] ss:$9 sm:$0xff] %v1631_v55  ;;  %v1783_v57 = vmul.f32 %v3483_v18, %v3288_v16  ;;  %v1786_v16 = vmul.f32 %v3501_v30, %v3306_v32 }
 0x13c   :  { %1455 = vmatpush.msra.mxu0 %v2309_v0  ;;  %1475 = vmatpush.msra.mxu1 %v2309_v0  ;;  %1650 = vst [vmem:[#allocation1 + $0x2] ss:$9 sm:$0xff] %v1632_v9 }
 0x13d   :  { %1530 = vmatpush.msra.mxu2 %v2309_v0  ;;  %1550 = vmatpush.msra.mxu3 %v2309_v0  ;;  %1652 = vst [vmem:[#allocation1 + $0x3] ss:$9 sm:$0xff] %v1633_v61 }
 0x13e   :  { %1456 = vmatmul.f32.vlgmr.msra.gmra.mxu0 %v3284_v4  ;;  %1476 = vmatmul.f32.vlgmr.msra.gmra.mxu1 %v3286_v5  ;;  %v3438_v4 = vld [vmem:[#allocation8 + $0x33] ss:$4 sm:$0x3]  ;;  %v3444_v5 = vld [vmem:[#allocation8 + $0x3b] ss:$4 sm:$0x3] }
 0x13f   :  { %1590 = vmatpush.msrb.mxu0 %v2309_v0  ;;  %1610 = vmatpush.msrb.mxu1 %v2309_v0  ;;  %v1636_v35 = vmul.f32 %v3438_v4, %v3231_v53  ;;  %v1637_v41 = vmul.f32 %v3444_v5, %v3239_v63  ;;  %1654 = vst [vmem:[#allocation1 + $0x4] ss:$9 sm:$0xff] %v1634_v28 }
 0x140   :  { %1665 = vmatpush.msrb.mxu2 %v2309_v0  ;;  %1685 = vmatpush.msrb.mxu3 %v2309_v0  ;;  %1656 = vst [vmem:[#allocation1 + $0x5] ss:$9 sm:$0xff] %v1635_v26  ;;  %v1861_v26 = vmul.f32 %v3501_v30, %v3372_v24  ;;  %v1930_v24 = vmul.f32 %v3467_v38, %v3398_v47 }
 0x141   :  { %1591 = vmatpush.msrb.mxu0 %v2309_v0  ;;  %1611 = vmatpush.msrb.mxu1 %v2309_v0  ;;  %1658 = vst [vmem:[#allocation1 + $0x6] ss:$9 sm:$0xff] %v1636_v35  ;;  %v1932_v35 = vmul.f32 %v3477_v46, %v3410_v56  ;;  %v1936_v56 = vmul.f32 %v3501_v30, %v3438_v4 }
 0x142   :  { %1666 = vmatpush.msrb.mxu2 %v2309_v0  ;;  %1686 = vmatpush.msrb.mxu3 %v2309_v0  ;;  %1660 = vst [vmem:[#allocation1 + $0x7] ss:$9 sm:$0xff] %v1637_v41 }
 0x143   :  { %1592 = vmatpush.msrb.mxu0 %v2309_v0  ;;  %1612 = vmatpush.msrb.mxu1 %v2309_v0 }
 0x144   :  { %1667 = vmatpush.msrb.mxu2 %v2309_v0  ;;  %1687 = vmatpush.msrb.mxu3 %v2309_v0 }
 0x145   :  { %1593 = vmatpush.msrb.mxu0 %v2309_v0  ;;  %1613 = vmatpush.msrb.mxu1 %v2309_v0 }
 0x146   :  { %1668 = vmatpush.msrb.mxu2 %v2309_v0  ;;  %1688 = vmatpush.msrb.mxu3 %v2309_v0 }
 0x147   :  { %1594 = vmatpush.msrb.mxu0 %v2309_v0  ;;  %1614 = vmatpush.msrb.mxu1 %v2309_v0 }
 0x148   :  { %1669 = vmatpush.msrb.mxu2 %v2309_v0  ;;  %1689 = vmatpush.msrb.mxu3 %v2309_v0 }
 0x149   :  { %1595 = vmatpush.msrb.mxu0 %v2309_v0  ;;  %1615 = vmatpush.msrb.mxu1 %v2309_v0  ;;  %v1661_v27 = vld [vmem:[#allocation1] sm:$0xff]  ;;  %v1662_v10 = vld [vmem:[#allocation1 + $0x9] sm:$0xff] }
 0x14a   :  { %1670 = vmatpush.msrb.mxu2 %v2309_v0  ;;  %1690 = vmatpush.msrb.mxu3 %v2309_v0  ;;  %1721 = vst [vmem:[#allocation1] ss:$9 sm:$0xff] %v1705_v31 }
 0x14b   :  { %2007 = vrot.lane.b32.xlu0 %v953_v12, %s2311_s0  ;;  %1596 = vmatpush.msrb.mxu0 %v2309_v0  ;;  %1723 = vst [vmem:[#allocation1 + $0x1] ss:$9 sm:$0xff] %v1706_v43  ;;  %v1858_v12 = vmul.f32 %v3483_v18, %v3354_v8 }
 0x14c   :  { %1616 = vmatpush.msrb.mxu1 %v2309_v0  ;;  %1671 = vmatpush.msrb.mxu2 %v2309_v0  ;;  %v857_v53 = vpop.f32.mrf.mxu0  ;;  %v877_v23 = vpop.f32.mrf.mxu1  ;;  %1725 = vst [vmem:[#allocation1 + $0x2] ss:$9 sm:$0xff] %v1707_v49 }
 0x14d   :  { %1691 = vmatpush.msrb.mxu3 %v2309_v0  ;;  %1597 = vmatpush.msrb.mxu0 %v2309_v0  ;;  %v3455_v63 = vadd.f32 %v877_v23, %v857_v53  ;;  %1727 = vst [vmem:[#allocation1 + $0x3] ss:$9 sm:$0xff] %v1708_v11  ;;  %v1933_v23 = vmul.f32 %v3483_v18, %v3420_v19 }
 0x14e   :  { %1617 = vmatpush.msrb.mxu1 %v2309_v0  ;;  %1672 = vmatpush.msrb.mxu2 %v2309_v0  ;;  %v1937_v19 = vmul.f32 %v3507_v25, %v3444_v5 }
 0x14f   :  { %1692 = vmatpush.msrb.mxu3 %v2309_v0  ;;  %1598 = vmatpush.msrb.mxu0 %v2309_v0 }
 0x150   :  { %1618 = vmatpush.msrb.mxu1 %v2309_v0  ;;  %1673 = vmatpush.msrb.mxu2 %v2309_v0 }
 0x151   :  { %1693 = vmatpush.msrb.mxu3 %v2309_v0  ;;  %1599 = vmatpush.msrb.mxu0 %v2309_v0 }
 0x152   :  { %1619 = vmatpush.msrb.mxu1 %v2309_v0  ;;  %1674 = vmatpush.msrb.mxu2 %v2309_v0 }
 0x153   :  { %1694 = vmatpush.msrb.mxu3 %v2309_v0  ;;  %1531 = vmatmul.f32.vlgmr.msra.gmra.mxu2 %v3350_v17  ;;  %v3489_v17 = vld [vmem:[#allocation6 + $0x23] ss:$4 sm:$0x3] }
 0x154   :  { %1551 = vmatmul.f32.vlgmr.msra.gmra.mxu3 %v3352_v50  ;;  %1600 = vmatpush.msrb.mxu0 %v2309_v0  ;;  %v1709_v22 = vmul.f32 %v3489_v17, %v3217_v36  ;;  %v3495_v50 = vld [vmem:[#allocation6 + $0x2b] ss:$4 sm:$0x3]  ;;  %v1711_v36 = vmul.f32 %v3501_v30, %v3233_v54  ;;  %v1780_v54 = vmul.f32 %v3467_v38, %v3270_v7 }
 0x155   :  { %1620 = vmatpush.msrb.mxu1 %v2309_v0  ;;  %1675 = vmatpush.msrb.mxu2 %v2309_v0  ;;  %v1710_v20 = vmul.f32 %v3495_v50, %v3225_v45  ;;  %v1712_v45 = vmul.f32 %v3507_v25, %v3241_v2  ;;  %v1007_v2 = vpop.f32.mrf.mxu0  ;;  %v1027_v34 = vpop.f32.mrf.mxu1  ;;  %v1784_v59 = vmul.f32 %v3489_v17, %v3294_v29 }
 0x156   :  { %1695 = vmatpush.msrb.mxu3 %v2309_v0  ;;  %1601 = vmatpush.msrb.mxu0 %v2309_v0  ;;  %1729 = vst [vmem:[#allocation1 + $0x4] ss:$9 sm:$0xff] %v1709_v22  ;;  %v1028_v1 = vadd.f32 %v1027_v34, %v1007_v2  ;;  %v1785_v14 = vmul.f32 %v3495_v50, %v3300_v42 }
 0x157   :  { %1621 = vmatpush.msrb.mxu1 %v2309_v0  ;;  %1676 = vmatpush.msrb.mxu2 %v2309_v0  ;;  %1731 = vst [vmem:[#allocation1 + $0x5] ss:$9 sm:$0xff] %v1710_v20  ;;  %v1787_v29 = vmul.f32 %v3507_v25, %v3312_v40  ;;  %v1855_v40 = vmul.f32 %v3467_v38, %v3332_v44 }
 0x158   :  { %1696 = vmatpush.msrb.mxu3 %v2309_v0  ;;  %1602 = vmatpush.msrb.mxu0 %v2309_v0  ;;  %1733 = vst [vmem:[#allocation1 + $0x6] ss:$9 sm:$0xff] %v1711_v36  ;;  %v1859_v44 = vmul.f32 %v3489_v17, %v3360_v13  ;;  %v1862_v13 = vmul.f32 %v3507_v25, %v3378_v37 }
 0x159   :  { %1622 = vmatpush.msrb.mxu1 %v2309_v0  ;;  %1677 = vmatpush.msrb.mxu2 %v2309_v0  ;;  %1735 = vst [vmem:[#allocation1 + $0x7] ss:$9 sm:$0xff] %v1712_v45  ;;  %v1931_v37 = vmul.f32 %v3471_v33, %v3404_v51  ;;  %v1934_v47 = vmul.f32 %v3489_v17, %v3426_v62 }
 0x15a   :  { %1697 = vmatpush.msrb.mxu3 %v2309_v0  ;;  %1603 = vmatpush.msrb.mxu0 %v2309_v0  ;;  %v1935_v51 = vmul.f32 %v3495_v50, %v3432_v3 }
 0x15b   :  { %1623 = vmatpush.msrb.mxu1 %v2309_v0  ;;  %1678 = vmatpush.msrb.mxu2 %v2309_v0 }
 0x15c   :  { %1698 = vmatpush.msrb.mxu3 %v2309_v0  ;;  %1604 = vmatpush.msrb.mxu0 %v2309_v0  ;;  %v1082_v42 = vpop.f32.mrf.mxu2  ;;  %v1102_v9 = vpop.f32.mrf.mxu3 }
 0x15d   :  { %1624 = vmatpush.msrb.mxu1 %v2309_v0  ;;  %1679 = vmatpush.msrb.mxu2 %v2309_v0  ;;  %v1103_v32 = vadd.f32 %v1102_v9, %v1082_v42 }
 0x15e   :  { %1699 = vmatpush.msrb.mxu3 %v2309_v0  ;;  %1605 = vmatpush.msrb.mxu0 %v2309_v0 }
 0x15f   :  { %1625 = vmatpush.msrb.mxu1 %v2309_v0  ;;  %1680 = vmatpush.msrb.mxu2 %v2309_v0 }
 0x160   :  { %1700 = vmatpush.msrb.mxu3 %v2309_v0  ;;  %1606 = vmatmul.f32.vlgmr.msrb.gmra.mxu0 %v3416_v58  ;;  %v3537_v55 = vld [vmem:[#allocation1] sm:$0xff]  ;;  %v3539_v7 = vld [vmem:[#allocation1 + $0x9] sm:$0xff]  ;;  %v1856_v58 = vmul.f32 %v3471_v33, %v3338_v48  ;;  %v1860_v48 = vmul.f32 %v3495_v50, %v3366_v15 }
 0x161   :  { %1626 = vmatmul.f32.vlgmr.msrb.gmra.mxu1 %v3418_v60  ;;  %1681 = vmatmul.f32.vlgmr.msrb.gmra.mxu2 %v1661_v27  ;;  %1796 = vst [vmem:[#allocation1] ss:$9 sm:$0xff] %v1780_v54  ;;  %v1857_v60 = vmul.f32 %v3477_v46, %v3344_v21 }
 0x162   :  { %1701 = vmatmul.f32.vlgmr.msrb.gmra.mxu3 %v1662_v10  ;;  %1740 = vmatpush.msra.mxu0 %v2309_v0  ;;  %1798 = vst [vmem:[#allocation1 + $0x1] ss:$9 sm:$0xff] %v1781_v39 }
 0x163   :  { %1760 = vmatpush.msra.mxu1 %v2309_v0  ;;  %1815 = vmatpush.msra.mxu2 %v2309_v0  ;;  %1800 = vst [vmem:[#allocation1 + $0x2] ss:$9 sm:$0xff] %v1782_v52 }
 0x164   :  { %1835 = vmatpush.msra.mxu3 %v2309_v0  ;;  %1741 = vmatpush.msra.mxu0 %v2309_v0  ;;  %1802 = vst [vmem:[#allocation1 + $0x3] ss:$9 sm:$0xff] %v1783_v57 }
 0x165   :  { %1761 = vmatpush.msra.mxu1 %v2309_v0  ;;  %1816 = vmatpush.msra.mxu2 %v2309_v0  ;;  %1804 = vst [vmem:[#allocation1 + $0x4] ss:$9 sm:$0xff] %v1784_v59 }
 0x166   :  { %1836 = vmatpush.msra.mxu3 %v2309_v0  ;;  %1742 = vmatpush.msra.mxu0 %v2309_v0  ;;  %1806 = vst [vmem:[#allocation1 + $0x5] ss:$9 sm:$0xff] %v1785_v14 }
 0x167   :  { %1762 = vmatpush.msra.mxu1 %v2309_v0  ;;  %1817 = vmatpush.msra.mxu2 %v2309_v0  ;;  %1808 = vst [vmem:[#allocation1 + $0x6] ss:$9 sm:$0xff] %v1786_v16 }
 0x168   :  { %1837 = vmatpush.msra.mxu3 %v2309_v0  ;;  %2011 = vrot.lane.b32.xlu0 %v1028_v1, %s2312_s2  ;;  %1810 = vst [vmem:[#allocation1 + $0x7] ss:$9 sm:$0xff] %v1787_v29 }
 0x169   :  { %1743 = vmatpush.msra.mxu0 %v2309_v0  ;;  %1763 = vmatpush.msra.mxu1 %v2309_v0 }
 0x16a   :  { %1818 = vmatpush.msra.mxu2 %v2309_v0  ;;  %1838 = vmatpush.msra.mxu3 %v2309_v0 }
 0x16b   :  { %1744 = vmatpush.msra.mxu0 %v2309_v0  ;;  %1764 = vmatpush.msra.mxu1 %v2309_v0 }
 0x16c   :  { %1819 = vmatpush.msra.mxu2 %v2309_v0  ;;  %1839 = vmatpush.msra.mxu3 %v2309_v0 }
 0x16d   :  { %1745 = vmatpush.msra.mxu0 %v2309_v0  ;;  %1765 = vmatpush.msra.mxu1 %v2309_v0 }
 0x16e   :  { %1820 = vmatpush.msra.mxu2 %v2309_v0  ;;  %1840 = vmatpush.msra.mxu3 %v2309_v0 }
 0x16f   :  { %2015 = vrot.lane.b32.xlu1 %v1103_v32, %s2313_s28  ;;  %1746 = vmatpush.msra.mxu0 %v2309_v0  ;;  %v1811_v61 = vld [vmem:[#allocation1] sm:$0xff]  ;;  %v1812_v28 = vld [vmem:[#allocation1 + $0x9] sm:$0xff] }
 0x170   :  { %1766 = vmatpush.msra.mxu1 %v2309_v0  ;;  %1821 = vmatpush.msra.mxu2 %v2309_v0  ;;  %1871 = vst [vmem:[#allocation1] ss:$9 sm:$0xff] %v1855_v40  ;;  %v2103_v40 = vld [vmem:[#allocation4 + $0x8] sm:$0xff] }
 0x171   :  { %1841 = vmatpush.msra.mxu3 %v2309_v0  ;;  %1747 = vmatpush.msra.mxu0 %v2309_v0  ;;  %1873 = vst [vmem:[#allocation1 + $0x1] ss:$9 sm:$0xff] %v1856_v58  ;;  %v2102_v58 = vld [vmem:[#allocation4] sm:$0xff] }
 0x172   :  { %1767 = vmatpush.msra.mxu1 %v2309_v0  ;;  %1822 = vmatpush.msra.mxu2 %v2309_v0  ;;  %1875 = vst [vmem:[#allocation1 + $0x2] ss:$9 sm:$0xff] %v1857_v60 }
 0x173   :  { %1842 = vmatpush.msra.mxu3 %v2309_v0  ;;  %1748 = vmatpush.msra.mxu0 %v2309_v0  ;;  %1877 = vst [vmem:[#allocation1 + $0x3] ss:$9 sm:$0xff] %v1858_v12 }
 0x174   :  { %1768 = vmatpush.msra.mxu1 %v2309_v0  ;;  %1823 = vmatpush.msra.mxu2 %v2309_v0  ;;  %1879 = vst [vmem:[#allocation1 + $0x4] ss:$9 sm:$0xff] %v1859_v44 }
 0x175   :  { %1843 = vmatpush.msra.mxu3 %v2309_v0  ;;  %1749 = vmatpush.msra.mxu0 %v2309_v0  ;;  %1881 = vst [vmem:[#allocation1 + $0x5] ss:$9 sm:$0xff] %v1860_v48 }
 0x176   :  { %1769 = vmatpush.msra.mxu1 %v2309_v0  ;;  %1824 = vmatpush.msra.mxu2 %v2309_v0  ;;  %1883 = vst [vmem:[#allocation1 + $0x6] ss:$9 sm:$0xff] %v1861_v26 }
 0x177   :  { %1844 = vmatpush.msra.mxu3 %v2309_v0  ;;  %1750 = vmatpush.msra.mxu0 %v2309_v0  ;;  %v1157_v21 = vpop.f32.mrf.mxu0  ;;  %v1177_v8 = vpop.f32.mrf.mxu1  ;;  %1885 = vst [vmem:[#allocation1 + $0x7] ss:$9 sm:$0xff] %v1862_v13 }
 0x178   :  { %1770 = vmatpush.msra.mxu1 %v2309_v0  ;;  %1825 = vmatpush.msra.mxu2 %v2309_v0  ;;  %v1178_v15 = vadd.f32 %v1177_v8, %v1157_v21 }
 0x179   :  { %1845 = vmatpush.msra.mxu3 %v2309_v0  ;;  %1751 = vmatpush.msra.mxu0 %v2309_v0 }
 0x17a   :  { %1771 = vmatpush.msra.mxu1 %v2309_v0  ;;  %1826 = vmatpush.msra.mxu2 %v2309_v0 }
 0x17b   :  { %1846 = vmatpush.msra.mxu3 %v2309_v0  ;;  %1752 = vmatpush.msra.mxu0 %v2309_v0 }
 0x17c   :  { %1772 = vmatpush.msra.mxu1 %v2309_v0  ;;  %1827 = vmatpush.msra.mxu2 %v2309_v0 }
 0x17d   :  { %1847 = vmatpush.msra.mxu3 %v2309_v0  ;;  %1753 = vmatpush.msra.mxu0 %v2309_v0 }
 0x17e   :  { %1773 = vmatpush.msra.mxu1 %v2309_v0  ;;  %1828 = vmatpush.msra.mxu2 %v2309_v0  ;;  %v3648_v41 = vld [vmem:[#allocation1] sm:$0xff]  ;;  %v3650_v53 = vld [vmem:[#allocation1 + $0x9] sm:$0xff] }
 0x17f   :  { %1848 = vmatpush.msra.mxu3 %v2309_v0  ;;  %1754 = vmatpush.msra.mxu0 %v2309_v0  ;;  %1946 = vst [vmem:[#allocation1] ss:$9 sm:$0xff] %v1930_v24 }
 0x180   :  { %1774 = vmatpush.msra.mxu1 %v2309_v0  ;;  %1829 = vmatpush.msra.mxu2 %v2309_v0  ;;  %1948 = vst [vmem:[#allocation1 + $0x1] ss:$9 sm:$0xff] %v1931_v37 }
 0x181   :  { %1849 = vmatpush.msra.mxu3 %v2309_v0  ;;  %1755 = vmatpush.msra.mxu0 %v2309_v0  ;;  %1950 = vst [vmem:[#allocation1 + $0x2] ss:$9 sm:$0xff] %v1932_v35 }
 0x182   :  { %1775 = vmatpush.msra.mxu1 %v2309_v0  ;;  %1830 = vmatpush.msra.mxu2 %v2309_v0  ;;  %1952 = vst [vmem:[#allocation1 + $0x3] ss:$9 sm:$0xff] %v1933_v23 }
 0x183   :  { %1850 = vmatpush.msra.mxu3 %v2309_v0  ;;  %1756 = vmatmul.f32.vlgmr.msra.gmra.mxu0 %v3537_v55  ;;  %1954 = vst [vmem:[#allocation1 + $0x4] ss:$9 sm:$0xff] %v1934_v47 }
 0x184   :  { %1776 = vmatmul.f32.vlgmr.msra.gmra.mxu1 %v3539_v7  ;;  %1831 = vmatmul.f32.vlgmr.msra.gmra.mxu2 %v1811_v61  ;;  %1956 = vst [vmem:[#allocation1 + $0x5] ss:$9 sm:$0xff] %v1935_v51 }
 0x185   :  { %1851 = vmatmul.f32.vlgmr.msra.gmra.mxu3 %v1812_v28  ;;  %1890 = vmatpush.msrb.mxu0 %v2309_v0  ;;  %1958 = vst [vmem:[#allocation1 + $0x6] ss:$9 sm:$0xff] %v1936_v56 }
 0x186   :  { %1910 = vmatpush.msrb.mxu1 %v2309_v0  ;;  %2019 = vrot.lane.b32.xlu1 %v1178_v15, %s2314_s29  ;;  %1960 = vst [vmem:[#allocation1 + $0x7] ss:$9 sm:$0xff] %v1937_v19 }
 0x187   :  { %1891 = vmatpush.msrb.mxu0 %v2309_v0  ;;  %1965 = vmatpush.msrb.mxu2 %v2309_v0 }
 0x188   :  { %1911 = vmatpush.msrb.mxu1 %v2309_v0  ;;  %1985 = vmatpush.msrb.mxu3 %v2309_v0 }
 0x189   :  { %1892 = vmatpush.msrb.mxu0 %v2309_v0  ;;  %1966 = vmatpush.msrb.mxu2 %v2309_v0 }
 0x18a   :  { %1912 = vmatpush.msrb.mxu1 %v2309_v0  ;;  %1986 = vmatpush.msrb.mxu3 %v2309_v0 }
 0x18b   :  { %1893 = vmatpush.msrb.mxu0 %v2309_v0  ;;  %1967 = vmatpush.msrb.mxu2 %v2309_v0 }
 0x18c   :  { %1913 = vmatpush.msrb.mxu1 %v2309_v0  ;;  %1987 = vmatpush.msrb.mxu3 %v2309_v0 }
 0x18d   :  { %1894 = vmatpush.msrb.mxu0 %v2309_v0  ;;  %1968 = vmatpush.msrb.mxu2 %v2309_v0  ;;  %v1961_v49 = vld [vmem:[#allocation1] sm:$0xff]  ;;  %v1962_v27 = vld [vmem:[#allocation1 + $0x9] sm:$0xff] }
 0x18e   :  { %1914 = vmatpush.msrb.mxu1 %v2309_v0  ;;  %1988 = vmatpush.msrb.mxu3 %v2309_v0 }
 0x18f   :  { %1895 = vmatpush.msrb.mxu0 %v2309_v0  ;;  %1969 = vmatpush.msrb.mxu2 %v2309_v0 }
 0x190   :  { %1915 = vmatpush.msrb.mxu1 %v2309_v0  ;;  %v1232_v62 = vpop.f32.mrf.mxu2  ;;  %v1252_v3 = vpop.f32.mrf.mxu3  ;;  %1989 = vmatpush.msrb.mxu3 %v2309_v0 }
 0x191   :  { %1896 = vmatpush.msrb.mxu0 %v2309_v0  ;;  %v1253_v38 = vadd.f32 %v1252_v3, %v1232_v62  ;;  %1970 = vmatpush.msrb.mxu2 %v2309_v0  ;;  %v2005_v3 = vld [vmem:[#allocation2] sm:$0xff] }
 0x192   :  { %1916 = vmatpush.msrb.mxu1 %v2309_v0  ;;  %1990 = vmatpush.msrb.mxu3 %v2309_v0 }
 0x193   :  { %1897 = vmatpush.msrb.mxu0 %v2309_v0  ;;  %2023 = vrot.lane.b32.xlu2 %v1253_v38, %s2315_s30 }
 0x194   :  { %1917 = vmatpush.msrb.mxu1 %v2309_v0  ;;  %1971 = vmatpush.msrb.mxu2 %v2309_v0 }
 0x195   :  { %1898 = vmatpush.msrb.mxu0 %v2309_v0  ;;  %1991 = vmatpush.msrb.mxu3 %v2309_v0 }
 0x196   :  { %1918 = vmatpush.msrb.mxu1 %v2309_v0  ;;  %1972 = vmatpush.msrb.mxu2 %v2309_v0 }
 0x197   :  { %1899 = vmatpush.msrb.mxu0 %v2309_v0  ;;  %1992 = vmatpush.msrb.mxu3 %v2309_v0 }
 0x198   :  { %1919 = vmatpush.msrb.mxu1 %v2309_v0  ;;  %1973 = vmatpush.msrb.mxu2 %v2309_v0 }
 0x199   :  { %1900 = vmatpush.msrb.mxu0 %v2309_v0  ;;  %v1307_v4 = vpop.f32.mrf.mxu0  ;;  %v1327_v5 = vpop.f32.mrf.mxu1  ;;  %1993 = vmatpush.msrb.mxu3 %v2309_v0 }
 0x19a   :  { %1920 = vmatpush.msrb.mxu1 %v2309_v0  ;;  %v1328_v31 = vadd.f32 %v1327_v5, %v1307_v4  ;;  %1974 = vmatpush.msrb.mxu2 %v2309_v0 }
 0x19b   :  { %1901 = vmatpush.msrb.mxu0 %v2309_v0  ;;  %1994 = vmatpush.msrb.mxu3 %v2309_v0 }
 0x19c   :  { %1921 = vmatpush.msrb.mxu1 %v2309_v0  ;;  %2027 = vrot.lane.b32.xlu2 %v1328_v31, %s2316_s4 }
 0x19d   :  { %1902 = vmatpush.msrb.mxu0 %v2309_v0  ;;  %1975 = vmatpush.msrb.mxu2 %v2309_v0 }
 0x19e   :  { %1922 = vmatpush.msrb.mxu1 %v2309_v0  ;;  %1995 = vmatpush.msrb.mxu3 %v2309_v0 }
 0x19f   :  { %1903 = vmatpush.msrb.mxu0 %v2309_v0  ;;  %1976 = vmatpush.msrb.mxu2 %v2309_v0 }
 0x1a0   :  { %1923 = vmatpush.msrb.mxu1 %v2309_v0  ;;  %v1382_v33 = vpop.f32.mrf.mxu2  ;;  %v1402_v43 = vpop.f32.mrf.mxu3  ;;  %1996 = vmatpush.msrb.mxu3 %v2309_v0 }
 0x1a1   :  { %1904 = vmatpush.msrb.mxu0 %v2309_v0  ;;  %v1403_v46 = vadd.f32 %v1402_v43, %v1382_v33  ;;  %1977 = vmatpush.msrb.mxu2 %v2309_v0 }
 0x1a2   :  { %1924 = vmatpush.msrb.mxu1 %v2309_v0  ;;  %1997 = vmatpush.msrb.mxu3 %v2309_v0 }
 0x1a3   :  { %1905 = vmatpush.msrb.mxu0 %v2309_v0  ;;  %2031 = vrot.lane.b32.xlu0 %v1403_v46, %s2317_s5 }
 0x1a4   :  { %1925 = vmatpush.msrb.mxu1 %v2309_v0  ;;  %1906 = vmatmul.f32.vlgmr.msrb.gmra.mxu0 %v3648_v41 }
 0x1a5   :  { %1926 = vmatmul.f32.vlgmr.msrb.gmra.mxu1 %v3650_v53  ;;  %1978 = vmatpush.msrb.mxu2 %v2309_v0 }
 0x1a6   :  { %1998 = vmatpush.msrb.mxu3 %v2309_v0  ;;  %2121 = vmatpush.msra.mxu0 %v2103_v40 }
 0x1a7   :  { %1979 = vmatpush.msrb.mxu2 %v2309_v0 }
 0x1a8   :  { %1999 = vmatpush.msrb.mxu3 %v2309_v0  ;;  %2122 = vmatpush.msra.mxu0 %v2102_v58 }
 0x1a9   :  { %1980 = vmatpush.msrb.mxu2 %v2309_v0 }
 0x1aa   :  { %2000 = vmatpush.msrb.mxu3 %v2309_v0  ;;  %1981 = vmatmul.f32.vlgmr.msrb.gmra.mxu2 %v1961_v49 }
 0x1ab   :  { %2001 = vmatmul.f32.vlgmr.msrb.gmra.mxu3 %v1962_v27  ;;  %v2131_v27 = vld [vmem:[#allocation3] sm:$0xff] }
 0x1bb   :  { %v1457_v10 = vpop.f32.mrf.mxu0  ;;  %v1477_v18 = vpop.f32.mrf.mxu1 }
 0x1bc   :  { %v1478_v11 = vadd.f32 %v1477_v18, %v1457_v10 }
 0x1bd   :  { %v2008_v29 = vpop.permute.xlu0 %2007 }
 0x1be   :  { %2035 = vrot.lane.b32.xlu1 %v1478_v11, %s2306_s21  ;;  %v2066_v12 = vsel %vm67_vm0, %v3455_v63, %v2008_v29 }
 0x1d6   :  { %v1532_v17 = vpop.f32.mrf.mxu2 }
 0x1d7   :  { %v1552_v22 = vpop.f32.mrf.mxu3 }
 0x1d8   :  { %v1553_v50 = vadd.f32 %v1552_v22, %v1532_v17 }
 0x1da   :  { %2039 = vrot.lane.b32.xlu2 %v1553_v50, %s2318_s6  ;;  %v2012_v32 = vpop.permute.xlu0 %2011 }
 0x1db   :  { %v2068_v44 = vsel %vm2067_vm2, %v2066_v12, %v2012_v32  ;;  %vm2127_vm2 = vcmask 195584  }
 0x1dd   :  { %v1607_v20 = vpop.f32.mrf.mxu0 }
 0x1de   :  { %v1627_v30 = vpop.f32.mrf.mxu1 }
 0x1df   :  { %v1628_v36 = vadd.f32 %v1627_v30, %v1607_v20 }
 0x1e1   :  { %2043 = vrot.lane.b32.xlu0 %v1628_v36, %s2319_s7  ;;  %v2016_v9 = vpop.permute.xlu1 %2015 }
 0x1e2   :  { %v2070_v6 = vsel %vm2069_vm3, %v2068_v44, %v2016_v9 }
 0x1e4   :  { %v1682_v25 = vpop.f32.mrf.mxu2 }
 0x1e5   :  { %v1702_v45 = vpop.f32.mrf.mxu3 }
 0x1e6   :  { %v1703_v0 = vadd.f32 %v1702_v45, %v1682_v25 }
 0x1e8   :  { %2047 = vrot.lane.b32.xlu1 %v1703_v0, %s2320_s8 }
 0x1ed   :  { %v2024_v42 = vpop.permute.xlu2 %2023 }
 0x1f6   :  { %v2028_v60 = vpop.permute.xlu2 %2027 }
 0x1f8   :  { %v2020_v61 = vpop.permute.xlu1 %2019 }
 0x1f9   :  { %v2072_v8 = vsel %vm2071_vm4, %v2070_v6, %v2020_v61 }
 0x1fa   :  { %v2074_v26 = vsel %vm2073_vm5, %v2072_v8, %v2024_v42 }
 0x1fb   :  { %v2076_v13 = vsel %vm2075_vm6, %v2074_v26, %v2028_v60 }
 0x200   :  { %v1757_v54 = vpop.f32.mrf.mxu0 }
 0x201   :  { %v1777_v2 = vpop.f32.mrf.mxu1 }
 0x202   :  { %v1778_v34 = vadd.f32 %v1777_v2, %v1757_v54 }
 0x204   :  { %2051 = vrot.lane.b32.xlu2 %v1778_v34, %s2321_s9 }
 0x207   :  { %v1832_v39 = vpop.f32.mrf.mxu2 }
 0x208   :  { %v1852_v52 = vpop.f32.mrf.mxu3 }
 0x209   :  { %v1853_v55 = vadd.f32 %v1852_v52, %v1832_v39 }
 0x20b   :  { %2055 = vrot.lane.b32.xlu0 %v1853_v55, %s2322_s10 }
 0x215   :  { %v2032_v28 = vpop.permute.xlu0 %2031 }
 0x216   :  { %v2078_v24 = vsel %vm2077_vm7, %v2076_v13, %v2032_v28 }
 0x221   :  { %v1907_v7 = vpop.f32.mrf.mxu0 }
 0x222   :  { %v1927_v57 = vpop.f32.mrf.mxu1 }
 0x223   :  { %v1928_v1 = vadd.f32 %v1927_v57, %v1907_v7 }
 0x225   :  { %2059 = vrot.lane.b32.xlu1 %v1928_v1, %s2323_s11 }
 0x22d   :  { %v1982_v59 = vpop.f32.mrf.mxu2 }
 0x22e   :  { %v2002_v14 = vpop.f32.mrf.mxu3 }
 0x22f   :  { %v2003_v16 = vadd.f32 %v2002_v14, %v1982_v59 }
 0x230   :  { %v2036_v21 = vpop.permute.xlu1 %2035 }
 0x231   :  { %2063 = vrot.lane.b32.xlu2 %v2003_v16, %s2324_s12  ;;  %v2080_v37 = vsel %vm2079_vm8, %v2078_v24, %v2036_v21 }
 0x234   :  { %v2040_v48 = vpop.permute.xlu2 %2039 }
 0x235   :  { %v2082_v63 = vsel %vm2081_vm9, %v2080_v37, %v2040_v48 }
 0x253   :  { %v2044_v15 = vpop.permute.xlu0 %2043 }
 0x254   :  { %v2084_v53 = vsel %vm2083_vm10, %v2082_v63, %v2044_v15 }
 0x25a   :  { %v2048_v41 = vpop.permute.xlu1 %2047 }
 0x25b   :  { %v2086_v23 = vsel %vm2085_vm11, %v2084_v53, %v2048_v41 }
 0x25e   :  { %v2052_v35 = vpop.permute.xlu2 %2051 }
 0x25f   :  { %v2088_v51 = vsel %vm2087_vm12, %v2086_v23, %v2052_v35 }
 0x27d   :  { %v2056_v47 = vpop.permute.xlu0 %2055 }
 0x27e   :  { %v2090_v19 = vsel %vm2089_vm13, %v2088_v51, %v2056_v47 }
 0x28b   :  { %v2064_v56 = vpop.permute.xlu2 %2063 }
 0x297   :  { %v2060_v62 = vpop.permute.xlu1 %2059 }
 0x298   :  { %v2092_v38 = vsel %vm2091_vm14, %v2090_v19, %v2060_v62 }
 0x299   :  { %v2094_v4 = vsel %vm2093_vm15, %v2092_v38, %v2064_v56 }
 0x29a   :  { %v2095_v5 = vadd.f32 %v2094_v4, %v2005_v3 }
 0x29c   :  { %2097 = vst.msk [vmem:[#allocation2] sm:$0xff] %vm65_vm1, %v2095_v5 }
 0x2a3   :  { %v2101_v31 = vld [vmem:[#allocation2] sm:$0xff] }
 0x2a4   :  { %2142 = vmatmul.msk.f32.vlgmr.msra.gmra.mxu0 %vm65_vm1, %v2101_v31 }
 0x321   :  { %v2124_v33 = vpop.f32.mrf.mxu0 }
 0x322   :  { %v2128_v43 = vsel %vm2127_vm2, %v2124_v33, -inf }
 0x323   :  { %2129 = vmax.xlane.f32.xlu0 %v2128_v43 }
 0x396   :  { %v2130_v46 = vpop.xlane.xlu0 %2129 }
 0x397   :  { %v2132_v49 = vmul.f32 2.0, %v2130_v46 }
 0x399   :  { %v2133_v10 = vsub.f32 %v2131_v27, %v2132_v49 }
 0x39b   :  { %v2134_v18 = vmul.f32 0.001953125, %v2133_v10 }
 0x39d   :  { %2135 = vst.msk [vmem:[%s3730_s3] sm:$0xff] %vm67_vm0, %v2134_v18 }
 0x39e   :  { %2140 = vsyncpa [#allocation5], 1 }
 0x39f   :  { %2141 = vsyncpa [#allocation7], 1 }

</bundles_post_ra>
